<compile_context>
chip_gen: v6e
topology: v6e:2x2x1
jax: 0.10.0
libtpu: 0.0.40
codegen_flags: <defaults>
</compile_context>

<pallas_src>
import functools

import jax
import jax.numpy as jnp
from jax.experimental import pallas as pl
from jax.experimental.pallas import tpu as pltpu

LANES = 128  # lane-padded feature width for every activation / weight slab


def _round_up(x, m):
    return (x + m - 1) // m * m


def _choose_row_tile(M):
    """Pick a large row tile (<=1024) but keep >=2 grid steps when possible (v7x megacore)."""
    M8 = _round_up(M, 8)
    TM = min(1024, M8)
    if M8 > 8 and M8 // TM < 2:
        TM = _round_up(-(-M8 // 2), 8)       # ceil(M8/2) rounded up to sublane multiple
    M_pad = _round_up(M8, TM)
    return TM, M_pad


# ----------------------------------------------------------------------------
# Fused kernels
# ----------------------------------------------------------------------------
def _ffn_mask_kernel(x_ref, m_ref, w1_ref, b1_ref, w2_ref, b2_ref, o_ref):
    """y = mask( relu(x @ w1 + b1) @ w2 + b2 );  mask zeroes rows where m != 0."""
    x = x_ref[...]  # (TM, 128) bf16
    h = jnp.dot(x, w1_ref[...], preferred_element_type=jnp.float32) + b1_ref[...]
    h = jnp.maximum(h, 0.0)
    y = jnp.dot(h.astype(jnp.bfloat16), w2_ref[...],
                preferred_element_type=jnp.float32) + b2_ref[...]
    keep = m_ref[...] == 0  # (TM, 1)
    y = jnp.where(keep, y, 0.0)
    o_ref[...] = y.astype(o_ref.dtype)


def fused_ffn_mask(x, mask_rows, w1, b1, w2, b2, *, out_dtype):
    """(M,128) bf16 @ weights, fused ReLU/bias/mask, row-tiled parallel grid."""
    M, K = x.shape
    N1 = w1.shape[1]
    N2 = w2.shape[1]
    TM, M_pad = _choose_row_tile(M)
    if M_pad != M:
        x = jnp.pad(x, ((0, M_pad - M), (0, 0)))
        mask_rows = jnp.pad(mask_rows, ((0, M_pad - M), (0, 0)), constant_values=1)

    out = pl.pallas_call(
        _ffn_mask_kernel,
        out_shape=jax.ShapeDtypeStruct((M_pad, N2), out_dtype),
        grid=(M_pad // TM,),
        in_specs=[
            pl.BlockSpec((TM, K), lambda i: (i, 0)),
            pl.BlockSpec((TM, 1), lambda i: (i, 0)),
            pl.BlockSpec((K, N1), lambda i: (0, 0)),
            pl.BlockSpec((1, N1), lambda i: (0, 0)),
            pl.BlockSpec((N1, N2), lambda i: (0, 0)),
            pl.BlockSpec((1, N2), lambda i: (0, 0)),
        ],
        out_specs=pl.BlockSpec((TM, N2), lambda i: (i, 0)),
        compiler_params=pltpu.CompilerParams(
            dimension_semantics=("parallel",),
            vmem_limit_bytes=32 * 1024 * 1024,
        ),
    )(x, mask_rows, w1, b1, w2, b2)
    return out[:M] if M_pad != M else out


def _dp_kernel(h_ref,
               wcat1_ref, b1_ref, g1_ref, be1_ref,
               wcat2_ref, b2_ref, g2_ref, be2_ref,
               w3_ref, b3_ref, o_ref, *, s_valid, n_valid):
    """Fused duration predictor for one batch element:
    conv1(k=3) -> ReLU -> LN -> conv2(k=3) -> ReLU -> LN -> linear(1), bf16 broadcast output.

    The k=3 'same' conv is one stacked matmul  y = x @ [wl|wc|wr]  (N=384), then the t-1 / t+1
    taps are recovered with pltpu.roll on the sublane (sequence) axis; the single wrapped
    boundary row of each rolled tap is zeroed to preserve zero-padding semantics."""
    h = h_ref[...]            # (S_pad, 128) bf16, rows >= s_valid are zero
    s_pad = h.shape[0]

    # Row masks built once (hoisted out of the conv layers).
    row = jax.lax.broadcasted_iota(jnp.int32, (s_pad, 1), 0)
    tmask = row < s_valid
    first_row = row == 0
    last_row = row == (s_pad - 1)
    inv_cnt = 1.0 / float(n_valid)

    def conv_ln(x_bf16, wcat, b, g, be):
        # One K=128, N=384 matmul for all three taps.
        y = jnp.dot(x_bf16, wcat, preferred_element_type=jnp.float32)   # (S_pad, 384)
        yl = pltpu.roll(y[:, 0 * LANES:1 * LANES], 1, 0)          # x[t-1] @ wl
        yc = y[:, 1 * LANES:2 * LANES]                             # x[t]   @ wc
        yr = pltpu.roll(y[:, 2 * LANES:3 * LANES], s_pad - 1, 0)  # x[t+1] @ wr
        yl = jnp.where(first_row, 0.0, yl)   # zero the wrapped row 0 (contribution of x[-1])
        yr = jnp.where(last_row, 0.0, yr)    # zero the wrapped last row (contribution of x[S])
        u = jnp.maximum(yl + yc + yr + b, 0.0)
        # LayerNorm over the n_valid real lanes.  Padded lanes of u are exactly zero (padded
        # weight/bias lanes are zero), so plain lane sums are correct; padded gamma/beta lanes
        # are zero, so padded output lanes stay zero.
        mean = jnp.sum(u, axis=-1, keepdims=True) * inv_cnt
        msq = jnp.sum(u * u, axis=-1, keepdims=True) * inv_cnt
        var = msq - mean * mean
        u = (u - mean) * jax.lax.rsqrt(var + 1e-5) * g + be
        # Zero rows beyond the real sequence so they cannot leak into the next conv.
        return jnp.where(tmask, u, 0.0)

    u1 = conv_ln(h, wcat1_ref[...], b1_ref[...], g1_ref[...], be1_ref[...])
    u2 = conv_ln(u1.astype(jnp.bfloat16), wcat2_ref[...], b2_ref[...], g2_ref[...], be2_ref[...])
    # Final conv_ch -> 1 projection as a VPU/XLU lane reduction; bf16 store (lane 0 is read back).
    ld = jnp.sum(u2 * w3_ref[...], axis=-1, keepdims=True)          # (S_pad, 1)
    out = ld + b3_ref[...]                                          # (S_pad, 128) via broadcast
    o_ref[...] = out.astype(o_ref.dtype)


def duration_predictor_pallas(h_src3, pp, *, s_valid, n_valid):
    B, S_pad, _ = h_src3.shape

    wspec = pl.BlockSpec((LANES, 3 * LANES), lambda b: (0, 0))
    vspec = pl.BlockSpec((1, LANES), lambda b: (0, 0))
    hspec = pl.BlockSpec((None, S_pad, LANES), lambda b: (b, 0, 0))

    return pl.pallas_call(
        functools.partial(_dp_kernel, s_valid=s_valid, n_valid=n_valid),
        out_shape=jax.ShapeDtypeStruct((B, S_pad, LANES), jnp.bfloat16),
        grid=(B,),
        in_specs=[hspec,
                  wspec, vspec, vspec, vspec,
                  wspec, vspec, vspec, vspec,
                  vspec, vspec],
        out_specs=hspec,
        compiler_params=pltpu.CompilerParams(
            dimension_semantics=("parallel",),
            vmem_limit_bytes=32 * 1024 * 1024,
        ),
    )(h_src3,
      pp["dp_wcat1"], pp["dp_b1"], pp["dp_ln1_g"], pp["dp_ln1_b"],
      pp["dp_wcat2"], pp["dp_b2"], pp["dp_ln2_g"], pp["dp_ln2_b"],
      pp["dp_w3"], pp["dp_b3"])


# ----------------------------------------------------------------------------
# Parameters (deterministic init) + one-time padding / bf16 pre-cast
# ----------------------------------------------------------------------------
def init_params(key, vocab=16, d_model=32, ffn=64, conv_ch=32, kernel=3, out_ch=8):
    keys = jax.random.split(key, 12)
    s = 0.05
    p = {
        "emb":     jax.random.normal(keys[0], (vocab, d_model)) * s,
        "enc_w1":  jax.random.normal(keys[1], (d_model, ffn)) * s,
        "enc_b1":  jnp.zeros((ffn,)),
        "enc_w2":  jax.random.normal(keys[2], (ffn, d_model)) * s,
        "enc_b2":  jnp.zeros((d_model,)),
        "dp_w1":   jax.random.normal(keys[3], (kernel * d_model, conv_ch)) * s,
        "dp_b1":   jnp.zeros((conv_ch,)),
        "dp_ln1_g": jnp.ones((conv_ch,)),
        "dp_ln1_b": jnp.zeros((conv_ch,)),
        "dp_w2":   jax.random.normal(keys[4], (kernel * conv_ch, conv_ch)) * s,
        "dp_b2":   jnp.zeros((conv_ch,)),
        "dp_ln2_g": jnp.ones((conv_ch,)),
        "dp_ln2_b": jnp.zeros((conv_ch,)),
        "dp_w3":   jax.random.normal(keys[5], (conv_ch, 1)) * s,
        "dp_b3":   jnp.zeros((1,)),
        "dec_w1":  jax.random.normal(keys[6], (d_model, ffn)) * s,
        "dec_b1":  jnp.zeros((ffn,)),
        "dec_w2":  jax.random.normal(keys[7], (ffn, out_ch)) * s,
        "dec_b2":  jnp.zeros((out_ch,)),
    }
    return jax.tree_util.tree_map(lambda a: a.astype(jnp.float32), p)


def _pad2(a, rows, cols):
    return jnp.pad(a, ((0, rows - a.shape[0]), (0, cols - a.shape[1])))


def _pad_row(v, cols):
    return jnp.pad(v, (0, cols - v.shape[0])).reshape(1, cols).astype(jnp.float32)


def prepare_params(p):
    """Zero-pad feature dims to 128 lanes, stack the k=3 conv taps to a (128,384) slab,
    and pre-cast matmul weights to bf16 (once)."""
    D = p["emb"].shape[1]
    C = p["dp_w1"].shape[1]

    def pw(a):
        return _pad2(a, LANES, LANES).astype(jnp.bfloat16)

    def conv_cat(w, k_in):
        # im2col order was [x(t-1), x(t), x(t+1)] -> stacked along the output (lane) axis.
        wl, wc, wr = w[0:k_in], w[k_in:2 * k_in], w[2 * k_in:3 * k_in]
        return jnp.concatenate([pw(wl), pw(wc), pw(wr)], axis=1)     # (128, 384) bf16

    return {
        "emb":     jnp.pad(p["emb"], ((0, 0), (0, LANES - D))).astype(jnp.bfloat16),
        "enc_w1":  pw(p["enc_w1"]), "enc_b1": _pad_row(p["enc_b1"], LANES),
        "enc_w2":  pw(p["enc_w2"]), "enc_b2": _pad_row(p["enc_b2"], LANES),
        "dp_wcat1": conv_cat(p["dp_w1"], D),
        "dp_b1":   _pad_row(p["dp_b1"], LANES),
        "dp_ln1_g": _pad_row(p["dp_ln1_g"], LANES),
        "dp_ln1_b": _pad_row(p["dp_ln1_b"], LANES),
        "dp_wcat2": conv_cat(p["dp_w2"], C),
        "dp_b2":   _pad_row(p["dp_b2"], LANES),
        "dp_ln2_g": _pad_row(p["dp_ln2_g"], LANES),
        "dp_ln2_b": _pad_row(p["dp_ln2_b"], LANES),
        "dp_w3":   _pad_row(p["dp_w3"][:, 0], LANES),
        "dp_b3":   (jnp.ones((1, LANES), jnp.float32) * p["dp_b3"].reshape(1, 1)),
        "dec_w1":  pw(p["dec_w1"]), "dec_b1": _pad_row(p["dec_b1"], LANES),
        "dec_w2":  pw(p["dec_w2"]), "dec_b2": _pad_row(p["dec_b2"], LANES),
    }


# ----------------------------------------------------------------------------
# FastSpeech forward (batch_first=True), fully jitted, static max target length
# ----------------------------------------------------------------------------
@functools.partial(jax.jit, static_argnames=("max_tgt_length", "conv_ch", "out_ch"))
def fastspeech_forward(pp, src, duration, *, max_tgt_length, conv_ch, out_ch):
    B, S = src.shape
    S_pad = _round_up(S, 8)
    T = int(max_tgt_length)
    T_pad = _round_up(max(T, 1), 8)

    # src_key_padding_mask = duration == 0  (batch_first=True)
    src_pad_mask = duration == 0
    if S_pad != S:
        src_pad_mask = jnp.pad(src_pad_mask, ((0, 0), (0, S_pad - S)), constant_values=True)

    # --- encoder: embedding lookup (JAX) + fused FFN+mask kernel -------------
    # TODO(synk): fold the (vocab,128) embedding gather into the encoder kernel via scalar-
    # prefetched token ids to drop one XLA gather + HBM round trip of the embeddings.
    emb = jnp.take(pp["emb"], src, axis=0)                        # (B, S, 128) bf16
    if S_pad != S:
        emb = jnp.pad(emb, ((0, 0), (0, S_pad - S), (0, 0)))
    x = emb.reshape(B * S_pad, LANES)
    src_mask_rows = src_pad_mask.reshape(B * S_pad, 1).astype(jnp.int32)
    h_src = fused_ffn_mask(x, src_mask_rows,
                           pp["enc_w1"], pp["enc_b1"], pp["enc_w2"], pp["enc_b2"],
                           out_dtype=jnp.bfloat16)
    h_src3 = h_src.reshape(B, S_pad, LANES)

    # --- duration predictor: one fused kernel per batch element --------------
    log_dur_lanes = duration_predictor_pallas(h_src3, pp, s_valid=S, n_valid=conv_ch)
    log_est_duration = log_dur_lanes[:, :S, 0].astype(jnp.float32)  # (B, S)

    # --- length regulator (duration provided -> linear_est_duration = duration)
    # TODO(synk): a scalar-prefetch Pallas gather (pl.Element / manual DMA) could feed the
    # decoder kernel directly from HBM and avoid this XLA gather round trip.
    linear_est_duration = duration
    tgt_length = jnp.sum(linear_est_duration, axis=1)             # (B,)
    cum = jnp.cumsum(linear_est_duration, axis=1)                 # (B, S)
    t_range = jnp.arange(T_pad, dtype=jnp.int32)
    idx = jax.vmap(lambda c: jnp.searchsorted(c, t_range, side="right"))(cum)
    idx = jnp.clip(idx, 0, S - 1).astype(jnp.int32)               # (B, T_pad)
    h_tgt = jnp.take_along_axis(h_src3, idx[..., None], axis=1)   # (B, T_pad, 128) bf16

    # create_padding_mask(tgt_length, T_pad)
    tgt_pad_mask = t_range[None, :] >= tgt_length[:, None]        # (B, T_pad)

    # --- decoder: fused FFN + projection + mask kernel ------------------------
    y = fused_ffn_mask(h_tgt.reshape(B * T_pad, LANES),
                       tgt_pad_mask.reshape(B * T_pad, 1).astype(jnp.int32),
                       pp["dec_w1"], pp["dec_b1"], pp["dec_w2"], pp["dec_b2"],
                       out_dtype=jnp.float32)
    # (B, tgt_length, out_channels) -> (B, out_channels, tgt_length)
    output = y.reshape(B, T_pad, LANES)[:, :T, :out_ch].transpose(0, 2, 1)
    return output, log_est_duration


# ----------------------------------------------------------------------------
if __name__ == "__main__":
    key = jax.random.PRNGKey(0)
    pkey, skey = jax.random.split(key)

    VOCAB, D_MODEL, FFN, CONV_CH, OUT_CH = 16, 32, 64, 32, 8
    B, S = 2, 8

    params = init_params(pkey, vocab=VOCAB, d_model=D_MODEL, ffn=FFN,
                         conv_ch=CONV_CH, kernel=3, out_ch=OUT_CH)
    pp = prepare_params(params)

    src = jax.random.randint(skey, (B, S), 0, VOCAB, dtype=jnp.int32)
    duration = jnp.array(
        [[2, 1, 3, 0, 2, 1, 2, 1],
         [1, 2, 2, 2, 0, 0, 3, 1]], dtype=jnp.int32)

    # Host-side input preparation (outside the jitted forward): static target length.
    max_tgt_length = int(jnp.max(jnp.sum(duration, axis=1)))

    output, log_est_duration = fastspeech_forward(
        pp, src, duration,
        max_tgt_length=max_tgt_length, conv_ch=CONV_CH, out_ch=OUT_CH)
    jax.block_until_ready((output, log_est_duration))

    assert output.shape == (B, OUT_CH, max_tgt_length), output.shape
    assert log_est_duration.shape == (B, S), log_est_duration.shape
    print("KERNEL_OK")
</pallas_src>

<mosaic_0001>
module attributes {stable_mosaic.version = 11 : i64} {
  func.func @_ffn_mask_kernel(%arg0: i32, %arg1: memref<8x128xbf16, #tpu.memory_space<vmem>>, %arg2: memref<8x1xi32, #tpu.memory_space<vmem>>, %arg3: memref<128x128xbf16, #tpu.memory_space<vmem>>, %arg4: memref<1x128xf32, #tpu.memory_space<vmem>>, %arg5: memref<128x128xbf16, #tpu.memory_space<vmem>>, %arg6: memref<1x128xf32, #tpu.memory_space<vmem>>, %arg7: memref<8x128xbf16, #tpu.memory_space<vmem>>) attributes {dimension_semantics = [#tpu.dimension_semantics<parallel>], iteration_bounds = array<i64: 2>, scalar_prefetch = 0 : i64, scratch_operands = 0 : i64, tpu.core_type = #tpu.core_type<tc>, window_params = [{transform_indices = @transform_0, window_bounds = array<i64: 8, 128>}, {transform_indices = @transform_1, window_bounds = array<i64: 8, 1>}, {pipeline_mode = #tpu.pipeline_mode<synchronous>, transform_indices = @transform_2, window_bounds = array<i64: 128, 128>}, {pipeline_mode = #tpu.pipeline_mode<synchronous>, transform_indices = @transform_3, window_bounds = array<i64: 1, 128>}, {pipeline_mode = #tpu.pipeline_mode<synchronous>, transform_indices = @transform_4, window_bounds = array<i64: 128, 128>}, {pipeline_mode = #tpu.pipeline_mode<synchronous>, transform_indices = @transform_5, window_bounds = array<i64: 1, 128>}, {transform_indices = @transform_6, window_bounds = array<i64: 8, 128>}]} {
    %c0 = arith.constant 0 : index
    %c0_0 = arith.constant 0 : index
    %0 = vector.load %arg1[%c0, %c0_0] : memref<8x128xbf16, #tpu.memory_space<vmem>>, vector<8x128xbf16>
    %c0_1 = arith.constant 0 : index
    %c0_2 = arith.constant 0 : index
    %1 = vector.load %arg3[%c0_1, %c0_2] : memref<128x128xbf16, #tpu.memory_space<vmem>>, vector<128x128xbf16>
    %cst = arith.constant dense<0.000000e+00> : vector<8x128xf32>
    %2 = tpu.matmul %0, %1, %cst {dimension_numbers = #tpu.dot_dimension_numbers<[1], [0], [0], [1], [0, 0, 1, 1], [], []>} : vector<8x128xbf16>, vector<128x128xbf16>, vector<8x128xf32> -> vector<8x128xf32>
    %c0_3 = arith.constant 0 : index
    %c0_4 = arith.constant 0 : index
    %3 = vector.load %arg4[%c0_3, %c0_4] : memref<1x128xf32, #tpu.memory_space<vmem>>, vector<1x128xf32>
    %4 = vector.broadcast %3 : vector<1x128xf32> to vector<8x128xf32>
    %5 = arith.addf %2, %4 : vector<8x128xf32>
    %cst_5 = arith.constant 0.000000e+00 : f32
    %6 = vector.broadcast %cst_5 : f32 to vector<8x128xf32>
    %7 = arith.maximumf %5, %6 : vector<8x128xf32>
    %8 = arith.truncf %7 : vector<8x128xf32> to vector<8x128xbf16>
    %c0_6 = arith.constant 0 : index
    %c0_7 = arith.constant 0 : index
    %9 = vector.load %arg5[%c0_6, %c0_7] : memref<128x128xbf16, #tpu.memory_space<vmem>>, vector<128x128xbf16>
    %cst_8 = arith.constant dense<0.000000e+00> : vector<8x128xf32>
    %10 = tpu.matmul %8, %9, %cst_8 {dimension_numbers = #tpu.dot_dimension_numbers<[1], [0], [0], [1], [0, 0, 1, 1], [], []>} : vector<8x128xbf16>, vector<128x128xbf16>, vector<8x128xf32> -> vector<8x128xf32>
    %c0_9 = arith.constant 0 : index
    %c0_10 = arith.constant 0 : index
    %11 = vector.load %arg6[%c0_9, %c0_10] : memref<1x128xf32, #tpu.memory_space<vmem>>, vector<1x128xf32>
    %12 = vector.broadcast %11 : vector<1x128xf32> to vector<8x128xf32>
    %13 = arith.addf %10, %12 : vector<8x128xf32>
    %c0_11 = arith.constant 0 : index
    %c0_12 = arith.constant 0 : index
    %14 = vector.load %arg2[%c0_11, %c0_12] : memref<8x1xi32, #tpu.memory_space<vmem>>, vector<8x1xi32>
    %c0_i32 = arith.constant 0 : i32
    %15 = vector.broadcast %c0_i32 : i32 to vector<8x1xi32>
    %16 = arith.cmpi eq, %14, %15 : vector<8x1xi32>
    %cst_13 = arith.constant 0.000000e+00 : f32
    %17 = vector.shape_cast %16 : vector<8x1xi1> to vector<8x1xi1>
    %18 = vector.broadcast %17 : vector<8x1xi1> to vector<8x128xi1>
    %19 = vector.broadcast %cst_13 : f32 to vector<8x128xf32>
    %20 = arith.select %18, %13, %19 : vector<8x128xi1>, vector<8x128xf32>
    %21 = arith.truncf %20 : vector<8x128xf32> to vector<8x128xbf16>
    %c0_14 = arith.constant 0 : index
    %c0_15 = arith.constant 0 : index
    %22 = vector.load %arg7[%c0_14, %c0_15] : memref<8x128xbf16, #tpu.memory_space<vmem>>, vector<8x128xbf16>
    tpu.vector_store %arg7[%c0_14, %c0_15], %21 {strides = array<i32>} : memref<8x128xbf16, #tpu.memory_space<vmem>>, vector<8x128xbf16>,
    return
  }
  func.func @transform_0(%arg0: i32) -> (i32, i32) {
    %c0_i32 = arith.constant 0 : i32
    %c0_i32_0 = arith.constant 0 : i32
    return %arg0, %c0_i32 : i32, i32
  }
  func.func @transform_1(%arg0: i32) -> (i32, i32) {
    %c0_i32 = arith.constant 0 : i32
    %c0_i32_0 = arith.constant 0 : i32
    return %arg0, %c0_i32 : i32, i32
  }
  func.func @transform_2(%arg0: i32) -> (i32, i32) {
    %c0_i32 = arith.constant 0 : i32
    %c0_i32_0 = arith.constant 0 : i32
    %c0_i32_1 = arith.constant 0 : i32
    return %c0_i32, %c0_i32_0 : i32, i32
  }
  func.func @transform_3(%arg0: i32) -> (i32, i32) {
    %c0_i32 = arith.constant 0 : i32
    %c0_i32_0 = arith.constant 0 : i32
    %c0_i32_1 = arith.constant 0 : i32
    return %c0_i32, %c0_i32_0 : i32, i32
  }
  func.func @transform_4(%arg0: i32) -> (i32, i32) {
    %c0_i32 = arith.constant 0 : i32
    %c0_i32_0 = arith.constant 0 : i32
    %c0_i32_1 = arith.constant 0 : i32
    return %c0_i32, %c0_i32_0 : i32, i32
  }
  func.func @transform_5(%arg0: i32) -> (i32, i32) {
    %c0_i32 = arith.constant 0 : i32
    %c0_i32_0 = arith.constant 0 : i32
    %c0_i32_1 = arith.constant 0 : i32
    return %c0_i32, %c0_i32_0 : i32, i32
  }
  func.func @transform_6(%arg0: i32) -> (i32, i32) {
    %c0_i32 = arith.constant 0 : i32
    %c0_i32_0 = arith.constant 0 : i32
    return %arg0, %c0_i32 : i32, i32
  }
}

module attributes {stable_mosaic.version = 11 : i64} {
  func.func @_dp_kernel(%arg0: i32, %arg1: memref<1x8x128xbf16, #tpu.memory_space<vmem>>, %arg2: memref<128x384xbf16, #tpu.memory_space<vmem>>, %arg3: memref<1x128xf32, #tpu.memory_space<vmem>>, %arg4: memref<1x128xf32, #tpu.memory_space<vmem>>, %arg5: memref<1x128xf32, #tpu.memory_space<vmem>>, %arg6: memref<128x384xbf16, #tpu.memory_space<vmem>>, %arg7: memref<1x128xf32, #tpu.memory_space<vmem>>, %arg8: memref<1x128xf32, #tpu.memory_space<vmem>>, %arg9: memref<1x128xf32, #tpu.memory_space<vmem>>, %arg10: memref<1x128xf32, #tpu.memory_space<vmem>>, %arg11: memref<1x128xf32, #tpu.memory_space<vmem>>, %arg12: memref<1x8x128xbf16, #tpu.memory_space<vmem>>) attributes {dimension_semantics = [#tpu.dimension_semantics<parallel>], iteration_bounds = array<i64: 2>, scalar_prefetch = 0 : i64, scratch_operands = 0 : i64, tpu.core_type = #tpu.core_type<tc>, window_params = [{transform_indices = @transform_0, window_bounds = array<i64: 1, 8, 128>}, {pipeline_mode = #tpu.pipeline_mode<synchronous>, transform_indices = @transform_1, window_bounds = array<i64: 128, 384>}, {pipeline_mode = #tpu.pipeline_mode<synchronous>, transform_indices = @transform_2, window_bounds = array<i64: 1, 128>}, {pipeline_mode = #tpu.pipeline_mode<synchronous>, transform_indices = @transform_3, window_bounds = array<i64: 1, 128>}, {pipeline_mode = #tpu.pipeline_mode<synchronous>, transform_indices = @transform_4, window_bounds = array<i64: 1, 128>}, {pipeline_mode = #tpu.pipeline_mode<synchronous>, transform_indices = @transform_5, window_bounds = array<i64: 128, 384>}, {pipeline_mode = #tpu.pipeline_mode<synchronous>, transform_indices = @transform_6, window_bounds = array<i64: 1, 128>}, {pipeline_mode = #tpu.pipeline_mode<synchronous>, transform_indices = @transform_7, window_bounds = array<i64: 1, 128>}, {pipeline_mode = #tpu.pipeline_mode<synchronous>, transform_indices = @transform_8, window_bounds = array<i64: 1, 128>}, {pipeline_mode = #tpu.pipeline_mode<synchronous>, transform_indices = @transform_9, window_bounds = array<i64: 1, 128>}, {pipeline_mode = #tpu.pipeline_mode<synchronous>, transform_indices = @transform_10, window_bounds = array<i64: 1, 128>}, {transform_indices = @transform_11, window_bounds = array<i64: 1, 8, 128>}]} {
    %c0 = arith.constant 0 : index
    %c0_0 = arith.constant 0 : index
    %c0_1 = arith.constant 0 : index
    %0 = vector.load %arg1[%c0, %c0_0, %c0_1] : memref<1x8x128xbf16, #tpu.memory_space<vmem>>, vector<1x8x128xbf16>
    %1 = vector.shape_cast %0 : vector<1x8x128xbf16> to vector<8x128xbf16>
    %2 = tpu.iota {dimensions = array<i32: 0>} : vector<8x1xi32>
    %c8_i32 = arith.constant 8 : i32
    %3 = vector.broadcast %c8_i32 : i32 to vector<8x1xi32>
    %4 = arith.cmpi slt, %2, %3 : vector<8x1xi32>
    %c0_i32 = arith.constant 0 : i32
    %5 = vector.broadcast %c0_i32 : i32 to vector<8x1xi32>
    %6 = arith.cmpi eq, %2, %5 : vector<8x1xi32>
    %c7_i32 = arith.constant 7 : i32
    %7 = vector.broadcast %c7_i32 : i32 to vector<8x1xi32>
    %8 = arith.cmpi eq, %2, %7 : vector<8x1xi32>
    %c0_2 = arith.constant 0 : index
    %c0_3 = arith.constant 0 : index
    %9 = vector.load %arg2[%c0_2, %c0_3] : memref<128x384xbf16, #tpu.memory_space<vmem>>, vector<128x384xbf16>
    %c0_4 = arith.constant 0 : index
    %c0_5 = arith.constant 0 : index
    %10 = vector.load %arg3[%c0_4, %c0_5] : memref<1x128xf32, #tpu.memory_space<vmem>>, vector<1x128xf32>
    %c0_6 = arith.constant 0 : index
    %c0_7 = arith.constant 0 : index
    %11 = vector.load %arg4[%c0_6, %c0_7] : memref<1x128xf32, #tpu.memory_space<vmem>>, vector<1x128xf32>
    %c0_8 = arith.constant 0 : index
    %c0_9 = arith.constant 0 : index
    %12 = vector.load %arg5[%c0_8, %c0_9] : memref<1x128xf32, #tpu.memory_space<vmem>>, vector<1x128xf32>
    %cst = arith.constant dense<0.000000e+00> : vector<8x384xf32>
    %13 = tpu.matmul %1, %9, %cst {dimension_numbers = #tpu.dot_dimension_numbers<[1], [0], [0], [1], [0, 0, 1, 1], [], []>} : vector<8x128xbf16>, vector<128x384xbf16>, vector<8x384xf32> -> vector<8x384xf32>
    %14 = vector.extract_strided_slice %13 {offsets = [0, 0], sizes = [8, 128], strides = [1, 1]} : vector<8x384xf32> to vector<8x128xf32>
    %c1_i32 = arith.constant 1 : i32
    %15 = tpu.dynamic_rotate %14 by %c1_i32 dim 0 : vector<8x128xf32>, i32 -> vector<8x128xf32>
    %16 = vector.extract_strided_slice %13 {offsets = [0, 128], sizes = [8, 128], strides = [1, 1]} : vector<8x384xf32> to vector<8x128xf32>
    %17 = vector.extract_strided_slice %13 {offsets = [0, 256], sizes = [8, 128], strides = [1, 1]} : vector<8x384xf32> to vector<8x128xf32>
    %c7_i32_10 = arith.constant 7 : i32
    %18 = tpu.dynamic_rotate %17 by %c7_i32_10 dim 0 : vector<8x128xf32>, i32 -> vector<8x128xf32>
    %cst_11 = arith.constant 0.000000e+00 : f32
    %19 = vector.shape_cast %6 : vector<8x1xi1> to vector<8x1xi1>
    %20 = vector.broadcast %19 : vector<8x1xi1> to vector<8x128xi1>
    %21 = vector.broadcast %cst_11 : f32 to vector<8x128xf32>
    %22 = arith.select %20, %21, %15 : vector<8x128xi1>, vector<8x128xf32>
    %cst_12 = arith.constant 0.000000e+00 : f32
    %23 = vector.shape_cast %8 : vector<8x1xi1> to vector<8x1xi1>
    %24 = vector.broadcast %23 : vector<8x1xi1> to vector<8x128xi1>
    %25 = vector.broadcast %cst_12 : f32 to vector<8x128xf32>
    %26 = arith.select %24, %25, %18 : vector<8x128xi1>, vector<8x128xf32>
    %27 = arith.addf %22, %16 : vector<8x128xf32>
    %28 = arith.addf %27, %26 : vector<8x128xf32>
    %29 = vector.broadcast %10 : vector<1x128xf32> to vector<8x128xf32>
    %30 = arith.addf %28, %29 : vector<8x128xf32>
    %cst_13 = arith.constant 0.000000e+00 : f32
    %31 = vector.broadcast %cst_13 : f32 to vector<8x128xf32>
    %32 = arith.maximumf %30, %31 : vector<8x128xf32>
    %cst_14 = arith.constant dense<0.000000e+00> : vector<8xf32>
    %33 = vector.multi_reduction <add>, %32, %cst_14 [1] : vector<8x128xf32> to vector<8xf32>
    %34 = vector.shape_cast %33 : vector<8xf32> to vector<8x1xf32>
    %cst_15 = arith.constant 3.125000e-02 : f32
    %35 = vector.broadcast %cst_15 : f32 to vector<8x1xf32>
    %36 = arith.mulf %34, %35 : vector<8x1xf32>
    %37 = arith.mulf %32, %32 : vector<8x128xf32>
    %cst_16 = arith.constant dense<0.000000e+00> : vector<8xf32>
    %38 = vector.multi_reduction <add>, %37, %cst_16 [1] : vector<8x128xf32> to vector<8xf32>
    %39 = vector.shape_cast %38 : vector<8xf32> to vector<8x1xf32>
    %cst_17 = arith.constant 3.125000e-02 : f32
    %40 = vector.broadcast %cst_17 : f32 to vector<8x1xf32>
    %41 = arith.mulf %39, %40 : vector<8x1xf32>
    %42 = arith.mulf %36, %36 : vector<8x1xf32>
    %43 = arith.subf %41, %42 : vector<8x1xf32>
    %44 = vector.broadcast %36 : vector<8x1xf32> to vector<8x128xf32>
    %45 = arith.subf %32, %44 : vector<8x128xf32>
    %cst_18 = arith.constant 9.99999974E-6 : f32
    %46 = vector.broadcast %cst_18 : f32 to vector<8x1xf32>
    %47 = arith.addf %43, %46 : vector<8x1xf32>
    %48 = math.rsqrt %47 : vector<8x1xf32>
    %49 = vector.broadcast %48 : vector<8x1xf32> to vector<8x128xf32>
    %50 = arith.mulf %45, %49 : vector<8x128xf32>
    %51 = vector.broadcast %11 : vector<1x128xf32> to vector<8x128xf32>
    %52 = arith.mulf %50, %51 : vector<8x128xf32>
    %53 = vector.broadcast %12 : vector<1x128xf32> to vector<8x128xf32>
    %54 = arith.addf %52, %53 : vector<8x128xf32>
    %cst_19 = arith.constant 0.000000e+00 : f32
    %55 = vector.shape_cast %4 : vector<8x1xi1> to vector<8x1xi1>
    %56 = vector.broadcast %55 : vector<8x1xi1> to vector<8x128xi1>
    %57 = vector.broadcast %cst_19 : f32 to vector<8x128xf32>
    %58 = arith.select %56, %54, %57 : vector<8x128xi1>, vector<8x128xf32>
    %59 = arith.truncf %58 : vector<8x128xf32> to vector<8x128xbf16>
    %c0_20 = arith.constant 0 : index
    %c0_21 = arith.constant 0 : index
    %60 = vector.load %arg6[%c0_20, %c0_21] : memref<128x384xbf16, #tpu.memory_space<vmem>>, vector<128x384xbf16>
    %c0_22 = arith.constant 0 : index
    %c0_23 = arith.constant 0 : index
    %61 = vector.load %arg7[%c0_22, %c0_23] : memref<1x128xf32, #tpu.memory_space<vmem>>, vector<1x128xf32>
    %c0_24 = arith.constant 0 : index
    %c0_25 = arith.constant 0 : index
    %62 = vector.load %arg8[%c0_24, %c0_25] : memref<1x128xf32, #tpu.memory_space<vmem>>, vector<1x128xf32>
    %c0_26 = arith.constant 0 : index
    %c0_27 = arith.constant 0 : index
    %63 = vector.load %arg9[%c0_26, %c0_27] : memref<1x128xf32, #tpu.memory_space<vmem>>, vector<1x128xf32>
    %cst_28 = arith.constant dense<0.000000e+00> : vector<8x384xf32>
    %64 = tpu.matmul %59, %60, %cst_28 {dimension_numbers = #tpu.dot_dimension_numbers<[1], [0], [0], [1], [0, 0, 1, 1], [], []>} : vector<8x128xbf16>, vector<128x384xbf16>, vector<8x384xf32> -> vector<8x384xf32>
    %65 = vector.extract_strided_slice %64 {offsets = [0, 0], sizes = [8, 128], strides = [1, 1]} : vector<8x384xf32> to vector<8x128xf32>
    %c1_i32_29 = arith.constant 1 : i32
    %66 = tpu.dynamic_rotate %65 by %c1_i32_29 dim 0 : vector<8x128xf32>, i32 -> vector<8x128xf32>
    %67 = vector.extract_strided_slice %64 {offsets = [0, 128], sizes = [8, 128], strides = [1, 1]} : vector<8x384xf32> to vector<8x128xf32>
    %68 = vector.extract_strided_slice %64 {offsets = [0, 256], sizes = [8, 128], strides = [1, 1]} : vector<8x384xf32> to vector<8x128xf32>
    %c7_i32_30 = arith.constant 7 : i32
    %69 = tpu.dynamic_rotate %68 by %c7_i32_30 dim 0 : vector<8x128xf32>, i32 -> vector<8x128xf32>
    %cst_31 = arith.constant 0.000000e+00 : f32
    %70 = vector.shape_cast %6 : vector<8x1xi1> to vector<8x1xi1>
    %71 = vector.broadcast %70 : vector<8x1xi1> to vector<8x128xi1>
    %72 = vector.broadcast %cst_31 : f32 to vector<8x128xf32>
    %73 = arith.select %71, %72, %66 : vector<8x128xi1>, vector<8x128xf32>
    %cst_32 = arith.constant 0.000000e+00 : f32
    %74 = vector.shape_cast %8 : vector<8x1xi1> to vector<8x1xi1>
    %75 = vector.broadcast %74 : vector<8x1xi1> to vector<8x128xi1>
    %76 = vector.broadcast %cst_32 : f32 to vector<8x128xf32>
    %77 = arith.select %75, %76, %69 : vector<8x128xi1>, vector<8x128xf32>
    %78 = arith.addf %73, %67 : vector<8x128xf32>
    %79 = arith.addf %78, %77 : vector<8x128xf32>
    %80 = vector.broadcast %61 : vector<1x128xf32> to vector<8x128xf32>
    %81 = arith.addf %79, %80 : vector<8x128xf32>
    %cst_33 = arith.constant 0.000000e+00 : f32
    %82 = vector.broadcast %cst_33 : f32 to vector<8x128xf32>
    %83 = arith.maximumf %81, %82 : vector<8x128xf32>
    %cst_34 = arith.constant dense<0.000000e+00> : vector<8xf32>
    %84 = vector.multi_reduction <add>, %83, %cst_34 [1] : vector<8x128xf32> to vector<8xf32>
    %85 = vector.shape_cast %84 : vector<8xf32> to vector<8x1xf32>
    %cst_35 = arith.constant 3.125000e-02 : f32
    %86 = vector.broadcast %cst_35 : f32 to vector<8x1xf32>
    %87 = arith.mulf %85, %86 : vector<8x1xf32>
    %88 = arith.mulf %83, %83 : vector<8x128xf32>
    %cst_36 = arith.constant dense<0.000000e+00> : vector<8xf32>
    %89 = vector.multi_reduction <add>, %88, %cst_36 [1] : vector<8x128xf32> to vector<8xf32>
    %90 = vector.shape_cast %89 : vector<8xf32> to vector<8x1xf32>
    %cst_37 = arith.constant 3.125000e-02 : f32
    %91 = vector.broadcast %cst_37 : f32 to vector<8x1xf32>
    %92 = arith.mulf %90, %91 : vector<8x1xf32>
    %93 = arith.mulf %87, %87 : vector<8x1xf32>
    %94 = arith.subf %92, %93 : vector<8x1xf32>
    %95 = vector.broadcast %87 : vector<8x1xf32> to vector<8x128xf32>
    %96 = arith.subf %83, %95 : vector<8x128xf32>
    %cst_38 = arith.constant 9.99999974E-6 : f32
    %97 = vector.broadcast %cst_38 : f32 to vector<8x1xf32>
    %98 = arith.addf %94, %97 : vector<8x1xf32>
    %99 = math.rsqrt %98 : vector<8x1xf32>
    %100 = vector.broadcast %99 : vector<8x1xf32> to vector<8x128xf32>
    %101 = arith.mulf %96, %100 : vector<8x128xf32>
    %102 = vector.broadcast %62 : vector<1x128xf32> to vector<8x128xf32>
    %103 = arith.mulf %101, %102 : vector<8x128xf32>
    %104 = vector.broadcast %63 : vector<1x128xf32> to vector<8x128xf32>
    %105 = arith.addf %103, %104 : vector<8x128xf32>
    %cst_39 = arith.constant 0.000000e+00 : f32
    %106 = vector.shape_cast %4 : vector<8x1xi1> to vector<8x1xi1>
    %107 = vector.broadcast %106 : vector<8x1xi1> to vector<8x128xi1>
    %108 = vector.broadcast %cst_39 : f32 to vector<8x128xf32>
    %109 = arith.select %107, %105, %108 : vector<8x128xi1>, vector<8x128xf32>
    %c0_40 = arith.constant 0 : index
    %c0_41 = arith.constant 0 : index
    %110 = vector.load %arg10[%c0_40, %c0_41] : memref<1x128xf32, #tpu.memory_space<vmem>>, vector<1x128xf32>
    %111 = vector.broadcast %110 : vector<1x128xf32> to vector<8x128xf32>
    %112 = arith.mulf %109, %111 : vector<8x128xf32>
    %cst_42 = arith.constant dense<0.000000e+00> : vector<8xf32>
    %113 = vector.multi_reduction <add>, %112, %cst_42 [1] : vector<8x128xf32> to vector<8xf32>
    %114 = vector.shape_cast %113 : vector<8xf32> to vector<8x1xf32>
    %c0_43 = arith.constant 0 : index
    %c0_44 = arith.constant 0 : index
    %115 = vector.load %arg11[%c0_43, %c0_44] : memref<1x128xf32, #tpu.memory_space<vmem>>, vector<1x128xf32>
    %116 = vector.broadcast %114 : vector<8x1xf32> to vector<8x128xf32>
    %117 = vector.broadcast %115 : vector<1x128xf32> to vector<8x128xf32>
    %118 = arith.addf %116, %117 : vector<8x128xf32>
    %119 = arith.truncf %118 : vector<8x128xf32> to vector<8x128xbf16>
    %c0_45 = arith.constant 0 : index
    %c0_46 = arith.constant 0 : index
    %c0_47 = arith.constant 0 : index
    %120 = vector.load %arg12[%c0_45, %c0_46, %c0_47] : memref<1x8x128xbf16, #tpu.memory_space<vmem>>, vector<1x8x128xbf16>
    %121 = vector.shape_cast %120 : vector<1x8x128xbf16> to vector<8x128xbf16>
    %122 = vector.shape_cast %119 : vector<8x128xbf16> to vector<1x8x128xbf16>
    tpu.vector_store %arg12[%c0_45, %c0_46, %c0_47], %122 {strides = array<i32>} : memref<1x8x128xbf16, #tpu.memory_space<vmem>>, vector<1x8x128xbf16>,
    return
  }
  func.func @transform_0(%arg0: i32) -> (i32, i32, i32) {
    %c0_i32 = arith.constant 0 : i32
    %c0_i32_0 = arith.constant 0 : i32
    %c0_i32_1 = arith.constant 0 : i32
    return %arg0, %c0_i32, %c0_i32_0 : i32, i32, i32
  }
  func.func @transform_1(%arg0: i32) -> (i32, i32) {
    %c0_i32 = arith.constant 0 : i32
    %c0_i32_0 = arith.constant 0 : i32
    %c0_i32_1 = arith.constant 0 : i32
    return %c0_i32, %c0_i32_0 : i32, i32
  }
  func.func @transform_2(%arg0: i32) -> (i32, i32) {
    %c0_i32 = arith.constant 0 : i32
    %c0_i32_0 = arith.constant 0 : i32
    %c0_i32_1 = arith.constant 0 : i32
    return %c0_i32, %c0_i32_0 : i32, i32
  }
  func.func @transform_3(%arg0: i32) -> (i32, i32) {
    %c0_i32 = arith.constant 0 : i32
    %c0_i32_0 = arith.constant 0 : i32
    %c0_i32_1 = arith.constant 0 : i32
    return %c0_i32, %c0_i32_0 : i32, i32
  }
  func.func @transform_4(%arg0: i32) -> (i32, i32) {
    %c0_i32 = arith.constant 0 : i32
    %c0_i32_0 = arith.constant 0 : i32
    %c0_i32_1 = arith.constant 0 : i32
    return %c0_i32, %c0_i32_0 : i32, i32
  }
  func.func @transform_5(%arg0: i32) -> (i32, i32) {
    %c0_i32 = arith.constant 0 : i32
    %c0_i32_0 = arith.constant 0 : i32
    %c0_i32_1 = arith.constant 0 : i32
    return %c0_i32, %c0_i32_0 : i32, i32
  }
  func.func @transform_6(%arg0: i32) -> (i32, i32) {
    %c0_i32 = arith.constant 0 : i32
    %c0_i32_0 = arith.constant 0 : i32
    %c0_i32_1 = arith.constant 0 : i32
    return %c0_i32, %c0_i32_0 : i32, i32
  }
  func.func @transform_7(%arg0: i32) -> (i32, i32) {
    %c0_i32 = arith.constant 0 : i32
    %c0_i32_0 = arith.constant 0 : i32
    %c0_i32_1 = arith.constant 0 : i32
    return %c0_i32, %c0_i32_0 : i32, i32
  }
  func.func @transform_8(%arg0: i32) -> (i32, i32) {
    %c0_i32 = arith.constant 0 : i32
    %c0_i32_0 = arith.constant 0 : i32
    %c0_i32_1 = arith.constant 0 : i32
    return %c0_i32, %c0_i32_0 : i32, i32
  }
  func.func @transform_9(%arg0: i32) -> (i32, i32) {
    %c0_i32 = arith.constant 0 : i32
    %c0_i32_0 = arith.constant 0 : i32
    %c0_i32_1 = arith.constant 0 : i32
    return %c0_i32, %c0_i32_0 : i32, i32
  }
  func.func @transform_10(%arg0: i32) -> (i32, i32) {
    %c0_i32 = arith.constant 0 : i32
    %c0_i32_0 = arith.constant 0 : i32
    %c0_i32_1 = arith.constant 0 : i32
    return %c0_i32, %c0_i32_0 : i32, i32
  }
  func.func @transform_11(%arg0: i32) -> (i32, i32, i32) {
    %c0_i32 = arith.constant 0 : i32
    %c0_i32_0 = arith.constant 0 : i32
    %c0_i32_1 = arith.constant 0 : i32
    return %arg0, %c0_i32, %c0_i32_0 : i32, i32, i32
  }
}

module attributes {stable_mosaic.version = 11 : i64} {
  func.func @_ffn_mask_kernel(%arg0: i32, %arg1: memref<16x128xbf16, #tpu.memory_space<vmem>>, %arg2: memref<16x1xi32, #tpu.memory_space<vmem>>, %arg3: memref<128x128xbf16, #tpu.memory_space<vmem>>, %arg4: memref<1x128xf32, #tpu.memory_space<vmem>>, %arg5: memref<128x128xbf16, #tpu.memory_space<vmem>>, %arg6: memref<1x128xf32, #tpu.memory_space<vmem>>, %arg7: memref<16x128xf32, #tpu.memory_space<vmem>>) attributes {dimension_semantics = [#tpu.dimension_semantics<parallel>], iteration_bounds = array<i64: 2>, scalar_prefetch = 0 : i64, scratch_operands = 0 : i64, tpu.core_type = #tpu.core_type<tc>, window_params = [{transform_indices = @transform_0, window_bounds = array<i64: 16, 128>}, {transform_indices = @transform_1, window_bounds = array<i64: 16, 1>}, {pipeline_mode = #tpu.pipeline_mode<synchronous>, transform_indices = @transform_2, window_bounds = array<i64: 128, 128>}, {pipeline_mode = #tpu.pipeline_mode<synchronous>, transform_indices = @transform_3, window_bounds = array<i64: 1, 128>}, {pipeline_mode = #tpu.pipeline_mode<synchronous>, transform_indices = @transform_4, window_bounds = array<i64: 128, 128>}, {pipeline_mode = #tpu.pipeline_mode<synchronous>, transform_indices = @transform_5, window_bounds = array<i64: 1, 128>}, {transform_indices = @transform_6, window_bounds = array<i64: 16, 128>}]} {
    %c0 = arith.constant 0 : index
    %c0_0 = arith.constant 0 : index
    %0 = vector.load %arg1[%c0, %c0_0] : memref<16x128xbf16, #tpu.memory_space<vmem>>, vector<16x128xbf16>
    %c0_1 = arith.constant 0 : index
    %c0_2 = arith.constant 0 : index
    %1 = vector.load %arg3[%c0_1, %c0_2] : memref<128x128xbf16, #tpu.memory_space<vmem>>, vector<128x128xbf16>
    %cst = arith.constant dense<0.000000e+00> : vector<16x128xf32>
    %2 = tpu.matmul %0, %1, %cst {dimension_numbers = #tpu.dot_dimension_numbers<[1], [0], [0], [1], [0, 0, 1, 1], [], []>} : vector<16x128xbf16>, vector<128x128xbf16>, vector<16x128xf32> -> vector<16x128xf32>
    %c0_3 = arith.constant 0 : index
    %c0_4 = arith.constant 0 : index
    %3 = vector.load %arg4[%c0_3, %c0_4] : memref<1x128xf32, #tpu.memory_space<vmem>>, vector<1x128xf32>
    %4 = vector.broadcast %3 : vector<1x128xf32> to vector<16x128xf32>
    %5 = arith.addf %2, %4 : vector<16x128xf32>
    %cst_5 = arith.constant 0.000000e+00 : f32
    %6 = vector.broadcast %cst_5 : f32 to vector<16x128xf32>
    %7 = arith.maximumf %5, %6 : vector<16x128xf32>
    %8 = arith.truncf %7 : vector<16x128xf32> to vector<16x128xbf16>
    %c0_6 = arith.constant 0 : index
    %c0_7 = arith.constant 0 : index
    %9 = vector.load %arg5[%c0_6, %c0_7] : memref<128x128xbf16, #tpu.memory_space<vmem>>, vector<128x128xbf16>
    %cst_8 = arith.constant dense<0.000000e+00> : vector<16x128xf32>
    %10 = tpu.matmul %8, %9, %cst_8 {dimension_numbers = #tpu.dot_dimension_numbers<[1], [0], [0], [1], [0, 0, 1, 1], [], []>} : vector<16x128xbf16>, vector<128x128xbf16>, vector<16x128xf32> -> vector<16x128xf32>
    %c0_9 = arith.constant 0 : index
    %c0_10 = arith.constant 0 : index
    %11 = vector.load %arg6[%c0_9, %c0_10] : memref<1x128xf32, #tpu.memory_space<vmem>>, vector<1x128xf32>
    %12 = vector.broadcast %11 : vector<1x128xf32> to vector<16x128xf32>
    %13 = arith.addf %10, %12 : vector<16x128xf32>
    %c0_11 = arith.constant 0 : index
    %c0_12 = arith.constant 0 : index
    %14 = vector.load %arg2[%c0_11, %c0_12] : memref<16x1xi32, #tpu.memory_space<vmem>>, vector<16x1xi32>
    %c0_i32 = arith.constant 0 : i32
    %15 = vector.broadcast %c0_i32 : i32 to vector<16x1xi32>
    %16 = arith.cmpi eq, %14, %15 : vector<16x1xi32>
    %cst_13 = arith.constant 0.000000e+00 : f32
    %17 = vector.shape_cast %16 : vector<16x1xi1> to vector<16x1xi1>
    %18 = vector.broadcast %17 : vector<16x1xi1> to vector<16x128xi1>
    %19 = vector.broadcast %cst_13 : f32 to vector<16x128xf32>
    %20 = arith.select %18, %13, %19 : vector<16x128xi1>, vector<16x128xf32>
    %c0_14 = arith.constant 0 : index
    %c0_15 = arith.constant 0 : index
    %21 = vector.load %arg7[%c0_14, %c0_15] : memref<16x128xf32, #tpu.memory_space<vmem>>, vector<16x128xf32>
    tpu.vector_store %arg7[%c0_14, %c0_15], %20 {strides = array<i32>} : memref<16x128xf32, #tpu.memory_space<vmem>>, vector<16x128xf32>,
    return
  }
  func.func @transform_0(%arg0: i32) -> (i32, i32) {
    %c0_i32 = arith.constant 0 : i32
    %c0_i32_0 = arith.constant 0 : i32
    return %arg0, %c0_i32 : i32, i32
  }
  func.func @transform_1(%arg0: i32) -> (i32, i32) {
    %c0_i32 = arith.constant 0 : i32
    %c0_i32_0 = arith.constant 0 : i32
    return %arg0, %c0_i32 : i32, i32
  }
  func.func @transform_2(%arg0: i32) -> (i32, i32) {
    %c0_i32 = arith.constant 0 : i32
    %c0_i32_0 = arith.constant 0 : i32
    %c0_i32_1 = arith.constant 0 : i32
    return %c0_i32, %c0_i32_0 : i32, i32
  }
  func.func @transform_3(%arg0: i32) -> (i32, i32) {
    %c0_i32 = arith.constant 0 : i32
    %c0_i32_0 = arith.constant 0 : i32
    %c0_i32_1 = arith.constant 0 : i32
    return %c0_i32, %c0_i32_0 : i32, i32
  }
  func.func @transform_4(%arg0: i32) -> (i32, i32) {
    %c0_i32 = arith.constant 0 : i32
    %c0_i32_0 = arith.constant 0 : i32
    %c0_i32_1 = arith.constant 0 : i32
    return %c0_i32, %c0_i32_0 : i32, i32
  }
  func.func @transform_5(%arg0: i32) -> (i32, i32) {
    %c0_i32 = arith.constant 0 : i32
    %c0_i32_0 = arith.constant 0 : i32
    %c0_i32_1 = arith.constant 0 : i32
    return %c0_i32, %c0_i32_0 : i32, i32
  }
  func.func @transform_6(%arg0: i32) -> (i32, i32) {
    %c0_i32 = arith.constant 0 : i32
    %c0_i32_0 = arith.constant 0 : i32
    return %arg0, %c0_i32 : i32, i32
  }
}

</mosaic_0001>

<bundles_post_ra>
// kernel: custom-call.5
= control target key start
LH: loop header
LB: loop body
LE: loop exit
PB: predicated region body
PF: predicated region fallthrough
CT: control target
= control target key end

     0   :  { %s6_s0 = inlined_call_operand.vmem [shape: u32[2,16], index: 0, kind: output, shape index: {}]  }

// kernel: squeeze.8
= control target key start
LH: loop header
LB: loop body
LE: loop exit
PB: predicated region body
PF: predicated region fallthrough
CT: control target
= control target key end

     0   :  { %vm8_vm0 = vcmask 130048   ;;  %s42_s0 = inlined_call_operand.vmem [shape: s32[32], index: 0, kind: input, shape index: {}]   ;;  %s43_s1 = inlined_call_operand.vmem [shape: s32[2,16], index: 1, kind: output, shape index: {}]  }
   0x1   :  { %v5_v0 = vld [vmem:[%s42_s0] sm:$0x1]  ;;  %s25_s0 = smov 112  }
   0x2   :  { %6 = vst [vmem:[#allocation1] sm:$0x1] %v5_v0 }
   0x9   :  { %v10_v1 = vld [vmem:[#allocation1] sm:$0x1]  }
   0xa   :  { %v7_v2 = vld [vmem:[#allocation1] sm:$0x1]   ;;  %11 = vrot.lane.b32.xlu0 %v10_v1, %s25_s0 }
   0xb   :  { %9 = vst.msk [vmem:[#allocation0] sm:$0x1] %vm8_vm0, %v7_v2  }
  0x7c   :  { %v12_v3 = vpop.permute.xlu0 %11  }
  0x7d   :  { %15 = vst.msk [vmem:[#allocation0 + $0x1] sm:$0x1] %vm8_vm0, %v12_v3  }
  0x84   :  { %v20_v4 = vld [vmem:[#allocation0] sm:$0x3] }
  0x85   :  { %23 = vst [vmem:[%s43_s1] sm:$0x3] %v20_v4 }

// kernel: fastspeech_forward.3
= control target key start
LH: loop header
LB: loop body
LE: loop exit
PB: predicated region body
PF: predicated region fallthrough
CT: control target
= control target key end

     0   :  { %s725_s21 = smov 0   ;;  %s811_s0 = inlined_call_operand.vmem [shape: bf16[16,128], index: 0, kind: input, shape index: {}]   ;;  %s812_s1 = inlined_call_operand.vmem [shape: s32[16,1], index: 1, kind: input, shape index: {}]   ;;  %s813_s2 = inlined_call_operand.vmem [shape: bf16[128,128], index: 2, kind: input, shape index: {}]   ;;  %s814_s3 = inlined_call_operand.vmem [shape: f32[1,128], index: 3, kind: input, shape index: {}]   ;;  %s815_s4 = inlined_call_operand.vmem [shape: bf16[128,128], index: 4, kind: input, shape index: {}]   ;;  %s816_s5 = inlined_call_operand.vmem [shape: f32[1,128], index: 5, kind: input, shape index: {}]   ;;  %s817_s6 = inlined_call_operand.vmem [shape: bf16[16,128], index: 6, kind: output, shape index: {}]  }
   0x1 LB: > { %s565_s22 = sadd.s32 4294967295, %s685_s21   ;;  %p569_p0 = scmp.ge.s32.totalorder %s685_s21, 1  ;;  %s685_s21 = sphi %s725_s21, %s16_s21  }
   0x2   : > { %p220_p1 = scmp.lt.s32.totalorder %s685_s21, 3 }
   0x4   : > { %p221_p2 = pnand %p569_p0, %p220_p1 }
   0x5   : > { %p252_p3 = scmp.lt.s32.totalorder (!%p221_p2), %s565_s22, 1 }
   0x6   : > { %224 = sbr.rel (%p221_p2) target bundleno = 442 (0x1ba), region = 44 }
   0xb   : > { %v663_v0 = vld [vmem:[%s813_s2 + $0x38] sm:$0xff]   ;;  %v687_v1 = vmov 0.0   ;;  %v664_v2 = vld [vmem:[%s813_s2 + $0x30] sm:$0xff]   ;;  %vm688_vm0 = vmmov 0   ;;  %v665_v3 = vld [vmem:[%s813_s2 + $0x28] sm:$0xff]   ;;  %s819_s22 = smov (!%p252_p3, %s565_s22), 1 }
   0xc   : > { %611 = vmatprep.subr.bf16.mxu0 %v687_v1  ;;  %631 = vmatprep.subr.bf16.mxu1 %v687_v1  ;;  %v671_v4 = vld [vmem:[%s815_s4 + $0x38] sm:$0xff]   ;;  %v666_v5 = vld [vmem:[%s813_s2 + $0x20] sm:$0xff]   ;;  %v672_v6 = vld [vmem:[%s815_s4 + $0x30] sm:$0xff]   ;;  %s570_s25 = sshll.u32 %s819_s22, 2  ;;  %s571_s13 = sshll.u32 %s819_s22, 3  ;;  %v689_v18 = vmov 0  }
   0xd   : > { %612 = vmatpush3.bf16.msra.mxu0 %v663_v0  ;;  %627 = vmatprep.mubr.msk.bf16.mxu0 %vm688_vm0, %v687_v1  ;;  %v667_v7 = vld [vmem:[%s813_s2 + $0x18] sm:$0xff]   ;;  %v673_v8 = vld [vmem:[%s815_s4 + $0x28] sm:$0xff]   ;;  %v668_v9 = vld [vmem:[%s813_s2 + $0x10] sm:$0xff]   ;;  %s255_s30 = scalar_lea.vmem %s811_s0, %s570_s25  ;;  %s259_s16 = scalar_lea.vmem %s812_s1, %s571_s13 }
   0xe   : > { %613 = vmatprep.subr.bf16.mxu0 %v687_v1  ;;  %647 = vmatprep.mubr.msk.bf16.mxu1 %vm688_vm0, %v687_v1  ;;  %v674_v10 = vld [vmem:[%s815_s4 + $0x20] sm:$0xff]   ;;  %v669_v11 = vld [vmem:[%s813_s2 + $0x8] sm:$0xff]   ;;  %v675_v12 = vld [vmem:[%s815_s4 + $0x18] sm:$0xff]   ;;  %s263_s26 = scalar_lea.vmem %s817_s6, %s570_s25 }
   0xf   : > { %632 = vmatpush3.bf16.msra.mxu1 %v671_v4  ;;  %v670_v13 = vld [vmem:[%s813_s2] sm:$0xff]   ;;  %v676_v14 = vld [vmem:[%s815_s4 + $0x10] sm:$0xff]   ;;  %v677_v16 = vld [vmem:[%s815_s4 + $0x8] sm:$0xff]   ;;  %662 = vset.pattern.permute.xlu0 %v689_v18 }
  0x10   : > { %633 = vmatprep.subr.bf16.mxu1 %v687_v1  ;;  %v265_v15 = vld [vmem:[%s255_s30] sm:$0xf] }
  0x11   : > { %614 = vmatpush3.bf16.msra.mxu0 %v664_v2  ;;  %v678_v17 = vld [vmem:[%s815_s4] sm:$0xff]  }
  0x12   : > { %615 = vmatprep.subr.bf16.mxu0 %v687_v1  ;;  %v490_v19 = vld [vmem:[%s259_s16] sm:$0xff] }
  0x13   : > { %634 = vmatpush3.bf16.msra.mxu1 %v672_v6  ;;  %vm491_vm1 = vcmp.eq.s32.totalorder %v490_v19, 0  ;;  %v573_v21 = vld [vmem:[%s814_s3] ss:$0 sm:$0xff] }
  0x14   : > { %635 = vmatprep.subr.bf16.mxu1 %v687_v1  ;;  %v492_v20 = vsel %vm491_vm1, 1, %v689_v18  ;;  %v582_v30 = vld [vmem:[%s816_s5] ss:$0 sm:$0xff] }
  0x15   : > { %616 = vmatpush3.bf16.msra.mxu0 %v665_v3  ;;  %494 = vperm.xlu0 %662, %v492_v20  }
  0x16   : > { %617 = vmatprep.subr.bf16.mxu0 %v687_v1 }
  0x17   : > { %636 = vmatpush3.bf16.msra.mxu1 %v673_v8 }
  0x18   : > { %637 = vmatprep.subr.bf16.mxu1 %v687_v1 }
  0x19   : > { %618 = vmatpush3.bf16.msra.mxu0 %v666_v5 }
  0x1a   : > { %619 = vmatprep.subr.bf16.mxu0 %v687_v1 }
  0x1b   : > { %638 = vmatpush3.bf16.msra.mxu1 %v674_v10 }
  0x1c   : > { %639 = vmatprep.subr.bf16.mxu1 %v687_v1 }
  0x1d   : > { %620 = vmatpush3.bf16.msra.mxu0 %v667_v7 }
  0x1e   : > { %621 = vmatprep.subr.bf16.mxu0 %v687_v1 }
  0x1f   : > { %640 = vmatpush3.bf16.msra.mxu1 %v675_v12 }
  0x20   : > { %641 = vmatprep.subr.bf16.mxu1 %v687_v1 }
  0x21   : > { %622 = vmatpush3.bf16.msra.mxu0 %v668_v9 }
  0x22   : > { %623 = vmatprep.subr.bf16.mxu0 %v687_v1 }
  0x23   : > { %642 = vmatpush3.bf16.msra.mxu1 %v676_v14 }
  0x24   : > { %643 = vmatprep.subr.bf16.mxu1 %v687_v1 }
  0x25   : > { %624 = vmatpush3.bf16.msra.mxu0 %v669_v11 }
  0x26   : > { %625 = vmatprep.subr.bf16.mxu0 %v687_v1 }
  0x27   : > { %644 = vmatpush3.bf16.msra.mxu1 %v677_v16 }
  0x28   : > { %645 = vmatprep.subr.bf16.mxu1 %v687_v1 }
  0x29   : > { %626 = vmatpush3.bf16.msra.mxu0 %v670_v13 }
  0x2b   : > { %646 = vmatpush3.bf16.msra.mxu1 %v678_v17 }
  0x2c   : > { %628 = vmatmul.mubr.bf16.vlgmr.msra.gmra.mxu0 %v265_v15 }
  0x90   : > { %v495_v29 = vpop.permute.xlu0 %494 }
  0x91   : > { %vm496_vm2 = vcmp.eq.s32.totalorder %v495_v29, 1 }
  0xec   : > { %v371_v22 = vpop.f32.mrf.mxu0 }
  0xed   : > { %v372_v23 = vadd.f32 %v573_v21, %v371_v22 }
  0xee   : > { %v629_v24 = vpop.f32.mrf.mxu0 }
  0xef   : > { %v377_v25 = vmax.f32 %v372_v23, 0.0 }
  0xf0   : > { %v374_v26 = vpop.f32.mrf.mxu0 }
  0xf1   : > { %v378_v27 = vpack.c.bf16 %v377_v25, %v377_v25 }
  0xf2   : > { %v630_v28 = vpop.f32.mrf.mxu0 }
  0xf3   : > { %648 = vmatmul.mubr.bf16.vlgmr.msra.gmra.mxu1 %v378_v27 }
 0x1b3   : > { %v484_v31 = vpop.f32.mrf.mxu1 }
 0x1b4   : > { %v485_v32 = vadd.f32 %v582_v30, %v484_v31 }
 0x1b5   : > { %v649_v33 = vpop.f32.mrf.mxu1 }
 0x1b6   : > { %v497_v34 = vsel %vm496_vm2, %v485_v32, 0.0 }
 0x1b7   : > { %v498_v35 = vpack.c.bf16 %v497_v34, %v497_v34  ;;  %v487_v36 = vpop.f32.mrf.mxu1 }
 0x1b9   : > { %499 = vst [vmem:[%s263_s26] sm:$0xf] %v498_v35  ;;  %v650_v37 = vpop.f32.mrf.mxu1 }
 0x1ba PF: > { %s16_s21 = sadd.s32 1, %s685_s21  }
 0x1bb   : > { %p13_p4 = scmp.ge.s32.totalorder %s16_s21, 4  }
 0x1bd   :  { %15 = sbr.rel (!%p13_p4) target bundleno = 1 (0x1), region = 77 }

// kernel: fastspeech_forward.4
= control target key start
LH: loop header
LB: loop body
LE: loop exit
PB: predicated region body
PF: predicated region fallthrough
CT: control target
= control target key end

     0   :  { %s1314_s17 = smov 0   ;;  %s1548_s0 = inlined_call_operand.vmem [shape: bf16[2,8,128], index: 0, kind: input, shape index: {}]   ;;  %s1549_s1 = inlined_call_operand.vmem [shape: bf16[128,384], index: 1, kind: input, shape index: {}]   ;;  %s1550_s2 = inlined_call_operand.vmem [shape: f32[1,128], index: 2, kind: input, shape index: {}]   ;;  %s1551_s3 = inlined_call_operand.vmem [shape: f32[1,128], index: 3, kind: input, shape index: {}]   ;;  %s1552_s4 = inlined_call_operand.vmem [shape: f32[1,128], index: 4, kind: input, shape index: {}]   ;;  %s1553_s5 = inlined_call_operand.vmem [shape: bf16[128,384], index: 5, kind: input, shape index: {}]   ;;  %s1554_s6 = inlined_call_operand.vmem [shape: f32[1,128], index: 6, kind: input, shape index: {}]   ;;  %s1555_s7 = inlined_call_operand.vmem [shape: f32[1,128], index: 7, kind: input, shape index: {}]   ;;  %s1556_s8 = inlined_call_operand.vmem [shape: f32[1,128], index: 8, kind: input, shape index: {}]   ;;  %s1557_s9 = inlined_call_operand.vmem [shape: f32[1,128], index: 9, kind: input, shape index: {}]   ;;  %s1558_s10 = inlined_call_operand.vmem [shape: f32[1,128], index: 10, kind: input, shape index: {}]   ;;  %s1559_s11 = inlined_call_operand.vmem [shape: bf16[2,8,128], index: 11, kind: output, shape index: {}]  }
   0x1 LB: > { %s1041_s18 = sadd.s32 4294967295, %s1249_s17   ;;  %p1045_p0 = scmp.ge.s32.totalorder %s1249_s17, 1  ;;  %s1249_s17 = sphi %s1314_s17, %s21_s17  }
   0x2   : > { %p336_p1 = scmp.lt.s32.totalorder %s1249_s17, 3 }
   0x4   : > { %p337_p2 = pnand %p1045_p0, %p336_p1 }
   0x5   : > { %p374_p3 = scmp.lt.s32.totalorder (!%p337_p2), %s1041_s18, 1 }
   0x6   : > { %340 = sbr.rel (%p337_p2) target bundleno = 936 (0x3a8), region = 64 }
   0xb   : > { %v1175_v0 = vld [vmem:[%s1549_s1 + $0xac] ss:$12 sps:$4 sm:$0xff]   ;;  %v1251_v1 = vmov 0.0   ;;  %v1177_v2 = vld [vmem:[%s1549_s1 + $0xb0] ss:$12 sps:$4 sm:$0xff]   ;;  %vm1252_vm0 = vmmov 0   ;;  %v384_v27 = vlaneseq }
   0xc   : > { %1124 = vmatprep.subr.bf16.mxu1 %v1251_v1  ;;  %1140 = vmatprep.mubr.msk.bf16.mxu1 %vm1252_vm0, %v1251_v1  ;;  %v1178_v3 = vld [vmem:[%s1549_s1 + $0xa8] ss:$12 sps:$4 sm:$0xff]   ;;  %v1253_v5 = vmov 0   ;;  %v1181_v6 = vld [vmem:[%s1549_s1 + $0x98] ss:$12 sps:$4 sm:$0xff]   ;;  %s1561_s18 = smov (!%p374_p3, %s1041_s18), 1 }
   0xd   : > { %552 = vmatprep.subr.bf16.mxu0 %v1175_v0  ;;  %1125 = vmatpush3.bf16.msra.mxu1 %v1177_v2  ;;  %v1179_v4 = vld [vmem:[%s1549_s1 + $0x94] ss:$12 sps:$4 sm:$0xff]   ;;  %v1182_v7 = vld [vmem:[%s1549_s1 + $0x90] ss:$12 sps:$4 sm:$0xff]   ;;  %v1186_v10 = vld [vmem:[%s1549_s1 + $0x78] ss:$12 sps:$4 sm:$0xff]  }
   0xe   : > { %584 = vmatprep.mubr.bf16.mxu0 %v1253_v5  ;;  %553 = vmatpush1.bf16.msra.mxu0 %v1178_v3  ;;  %v1183_v8 = vld [vmem:[%s1549_s1 + $0x7c] ss:$12 sps:$4 sm:$0xff]   ;;  %v1185_v9 = vld [vmem:[%s1549_s1 + $0x80] ss:$12 sps:$4 sm:$0xff]   ;;  %v1187_v11 = vld [vmem:[%s1549_s1 + $0x64] ss:$12 sps:$4 sm:$0xff]  }
   0xf   : > { %1126 = vmatprep.subr.bf16.mxu1 %v1251_v1  ;;  %554 = vmatprep.subr.bf16.mxu0 %v1179_v4  ;;  %v1189_v12 = vld [vmem:[%s1549_s1 + $0x68] ss:$12 sps:$4 sm:$0xff]   ;;  %v1190_v13 = vld [vmem:[%s1549_s1 + $0x60] ss:$12 sps:$4 sm:$0xff]   ;;  %v1193_v15 = vld [vmem:[%s1549_s1 + $0x50] ss:$12 sps:$4 sm:$0xff]  }
  0x10   : > { %v1191_v14 = vld [vmem:[%s1549_s1 + $0x4c] ss:$12 sps:$4 sm:$0xff]   ;;  %v1194_v16 = vld [vmem:[%s1549_s1 + $0x48] ss:$12 sps:$4 sm:$0xff]   ;;  %v1198_v19 = vld [vmem:[%s1549_s1 + $0x30] ss:$12 sps:$4 sm:$0xff]  }
  0x11   : > { %1127 = vmatpush3.bf16.msra.mxu1 %v1181_v6  ;;  %v1195_v17 = vld [vmem:[%s1549_s1 + $0x34] ss:$12 sps:$4 sm:$0xff]   ;;  %v1197_v18 = vld [vmem:[%s1549_s1 + $0x38] ss:$12 sps:$4 sm:$0xff]   ;;  %v1199_v20 = vld [vmem:[%s1549_s1 + $0x1c] ss:$12 sps:$4 sm:$0xff]  }
  0x12   : > { %555 = vmatpush1.bf16.msra.mxu0 %v1182_v7  ;;  %1128 = vmatprep.subr.bf16.mxu1 %v1251_v1  ;;  %v1201_v21 = vld [vmem:[%s1549_s1 + $0x20] ss:$12 sps:$4 sm:$0xff]   ;;  %v1202_v22 = vld [vmem:[%s1549_s1 + $0x18] ss:$12 sps:$4 sm:$0xff]   ;;  %v1205_v24 = vld [vmem:[%s1549_s1 + $0x8] ss:$12 sps:$4 sm:$0xff]  }
  0x13   : > { %556 = vmatprep.subr.bf16.mxu0 %v1183_v8  ;;  %v1203_v23 = vld [vmem:[%s1549_s1 + $0x4] ss:$12 sps:$4 sm:$0xff]   ;;  %s1046_s12 = sshll.u32 %s1561_s18, 2  ;;  %v1206_v25 = vld [vmem:[%s1549_s1] ss:$12 sps:$4 sm:$0xff]   ;;  %v1419_v28 = vshrl.u32 %v384_v27, 7 }
  0x14   : > { %s377_s19 = scalar_lea.vmem %s1548_s0, %s1046_s12  ;;  %v1072_v41 = vld [vmem:[%s1550_s2] ss:$0 sm:$0xff]  ;;  %v1209_v47 = vld [vmem:[%s1553_s5 + $0xac] ss:$12 sps:$4 sm:$0xff]   ;;  %v1207_v48 = vld [vmem:[%s1553_s5 + $0xa8] ss:$12 sps:$4 sm:$0xff]   ;;  %s381_s22 = scalar_lea.vmem %s1559_s11, %s1046_s12 }
  0x15   : > { %1129 = vmatpush3.bf16.msra.mxu1 %v1185_v9  ;;  %v383_v26 = vld [vmem:[%s377_s19] sm:$0xf]  ;;  %vm388_vm1 = vcmp.eq.s32.totalorder %v1419_v28, 7  ;;  %vm387_vm2 = vcmp.eq.s32.totalorder %v1419_v28, 0  ;;  %v1210_v49 = vld [vmem:[%s1553_s5 + $0xb0] ss:$12 sps:$4 sm:$0xff]  }
  0x16   : > { %557 = vmatpush1.bf16.msra.mxu0 %v1186_v10  ;;  %1130 = vmatprep.subr.bf16.mxu1 %v1251_v1  ;;  %v1213_v50 = vld [vmem:[%s1553_s5 + $0x94] ss:$12 sps:$4 sm:$0xff]   ;;  %v1211_v51 = vld [vmem:[%s1553_s5 + $0x90] ss:$12 sps:$4 sm:$0xff]   ;;  %v1214_v52 = vld [vmem:[%s1553_s5 + $0x98] ss:$12 sps:$4 sm:$0xff]  }
  0x17   : > { %558 = vmatprep.subr.bf16.mxu0 %v1187_v11  ;;  %v1217_v53 = vld [vmem:[%s1553_s5 + $0x7c] ss:$12 sps:$4 sm:$0xff]   ;;  %v1215_v54 = vld [vmem:[%s1553_s5 + $0x78] ss:$12 sps:$4 sm:$0xff]   ;;  %v1218_v55 = vld [vmem:[%s1553_s5 + $0x80] ss:$12 sps:$4 sm:$0xff]  }
  0x18   : > { %v1219_v56 = vld [vmem:[%s1553_s5 + $0x60] ss:$12 sps:$4 sm:$0xff]   ;;  %v1221_v57 = vld [vmem:[%s1553_s5 + $0x64] ss:$12 sps:$4 sm:$0xff]   ;;  %v1222_v58 = vld [vmem:[%s1553_s5 + $0x68] ss:$12 sps:$4 sm:$0xff]  }
  0x19   : > { %1131 = vmatpush3.bf16.msra.mxu1 %v1189_v12  ;;  %v1225_v59 = vld [vmem:[%s1553_s5 + $0x4c] ss:$12 sps:$4 sm:$0xff]   ;;  %v1223_v60 = vld [vmem:[%s1553_s5 + $0x48] ss:$12 sps:$4 sm:$0xff]   ;;  %v1226_v61 = vld [vmem:[%s1553_s5 + $0x50] ss:$12 sps:$4 sm:$0xff]  }
  0x1a   : > { %559 = vmatpush1.bf16.msra.mxu0 %v1190_v13  ;;  %1132 = vmatprep.subr.bf16.mxu1 %v1251_v1  ;;  %v1229_v62 = vld [vmem:[%s1553_s5 + $0x34] ss:$12 sps:$4 sm:$0xff]   ;;  %v1227_v63 = vld [vmem:[%s1553_s5 + $0x30] ss:$12 sps:$4 sm:$0xff]   ;;  %v1230_v0 = vld [vmem:[%s1553_s5 + $0x38] ss:$12 sps:$4 sm:$0xff]  }
  0x1b   : > { %560 = vmatprep.subr.bf16.mxu0 %v1191_v14  ;;  %v1233_v2 = vld [vmem:[%s1553_s5 + $0x1c] ss:$12 sps:$4 sm:$0xff]   ;;  %v1231_v3 = vld [vmem:[%s1553_s5 + $0x18] ss:$12 sps:$4 sm:$0xff]   ;;  %v1234_v4 = vld [vmem:[%s1553_s5 + $0x20] ss:$12 sps:$4 sm:$0xff]  }
  0x1c   : > { %v1235_v6 = vld [vmem:[%s1553_s5] ss:$12 sps:$4 sm:$0xff]   ;;  %v1238_v7 = vld [vmem:[%s1553_s5 + $0x8] ss:$12 sps:$4 sm:$0xff]  }
  0x1d   : > { %1133 = vmatpush3.bf16.msra.mxu1 %v1193_v15 }
  0x1e   : > { %561 = vmatpush1.bf16.msra.mxu0 %v1194_v16  ;;  %1134 = vmatprep.subr.bf16.mxu1 %v1251_v1 }
  0x1f   : > { %562 = vmatprep.subr.bf16.mxu0 %v1195_v17  ;;  %v1073_v17 = vld [vmem:[%s1551_s3] ss:$0 sm:$0xff] }
  0x21   : > { %1135 = vmatpush3.bf16.msra.mxu1 %v1197_v18 }
  0x22   : > { %563 = vmatpush1.bf16.msra.mxu0 %v1198_v19  ;;  %1136 = vmatprep.subr.bf16.mxu1 %v1251_v1 }
  0x23   : > { %564 = vmatprep.subr.bf16.mxu0 %v1199_v20 }
  0x25   : > { %1137 = vmatpush3.bf16.msra.mxu1 %v1201_v21 }
  0x26   : > { %565 = vmatpush1.bf16.msra.mxu0 %v1202_v22  ;;  %1138 = vmatprep.subr.bf16.mxu1 %v1251_v1 }
  0x27   : > { %566 = vmatprep.subr.bf16.mxu0 %v1203_v23 }
  0x29   : > { %1139 = vmatpush3.bf16.msra.mxu1 %v1205_v24 }
  0x2a   : > { %567 = vmatpush1.bf16.msra.mxu0 %v1206_v25  ;;  %1144 = vmatprep.subr.bf16.mxu1 %v1251_v1 }
  0x2b   : > { %845 = vmatprep.subr.bf16.mxu0 %v1209_v47 }
  0x2c   : > { %1141 = vmatmul.mubr.bf16.vlgmr.msra.gmra.mxu1 %v383_v26 }
  0x2d   : > { %585 = vmatmul.mubr.bf16.vlgmr.msra.gmra.mxu0 %v383_v26  ;;  %1160 = vmatprep.mubr.msk.bf16.mxu1 %vm1252_vm0, %v1251_v1 }
  0x2e   : > { %877 = vmatprep.mubr.bf16.mxu0 %v1253_v5  ;;  %846 = vmatpush1.bf16.msra.mxu0 %v1207_v48  ;;  %v1237_v5 = vld [vmem:[%s1553_s5 + $0x4] ss:$12 sps:$4 sm:$0xff]  }
  0x2f   : > { %1145 = vmatpush3.bf16.msra.mxu1 %v1210_v49  ;;  %847 = vmatprep.subr.bf16.mxu0 %v1213_v50  ;;  %v1100_v49 = vld [vmem:[%s1555_s7] ss:$0 sm:$0xff] }
  0x30   : > { %1146 = vmatprep.subr.bf16.mxu1 %v1251_v1 }
  0x32   : > { %848 = vmatpush1.bf16.msra.mxu0 %v1211_v51  ;;  %v1101_v51 = vld [vmem:[%s1556_s8] ss:$0 sm:$0xff] }
  0x33   : > { %1147 = vmatpush3.bf16.msra.mxu1 %v1214_v52  ;;  %849 = vmatprep.subr.bf16.mxu0 %v1217_v53  ;;  %v1102_v53 = vld [vmem:[%s1557_s9] ss:$0 sm:$0xff] }
  0x34   : > { %1148 = vmatprep.subr.bf16.mxu1 %v1251_v1 }
  0x36   : > { %850 = vmatpush1.bf16.msra.mxu0 %v1215_v54 }
  0x37   : > { %1149 = vmatpush3.bf16.msra.mxu1 %v1218_v55  ;;  %851 = vmatprep.subr.bf16.mxu0 %v1221_v57 }
  0x38   : > { %1150 = vmatprep.subr.bf16.mxu1 %v1251_v1 }
  0x3a   : > { %852 = vmatpush1.bf16.msra.mxu0 %v1219_v56  ;;  %v1103_v56 = vld [vmem:[%s1558_s10] ss:$0 sm:$0xff] }
  0x3b   : > { %1151 = vmatpush3.bf16.msra.mxu1 %v1222_v58  ;;  %853 = vmatprep.subr.bf16.mxu0 %v1225_v59 }
  0x3c   : > { %1152 = vmatprep.subr.bf16.mxu1 %v1251_v1 }
  0x3e   : > { %854 = vmatpush1.bf16.msra.mxu0 %v1223_v60 }
  0x3f   : > { %1153 = vmatpush3.bf16.msra.mxu1 %v1226_v61  ;;  %855 = vmatprep.subr.bf16.mxu0 %v1229_v62 }
  0x40   : > { %1154 = vmatprep.subr.bf16.mxu1 %v1251_v1 }
  0x42   : > { %856 = vmatpush1.bf16.msra.mxu0 %v1227_v63 }
  0x43   : > { %1155 = vmatpush3.bf16.msra.mxu1 %v1230_v0  ;;  %857 = vmatprep.subr.bf16.mxu0 %v1233_v2 }
  0x44   : > { %1156 = vmatprep.subr.bf16.mxu1 %v1251_v1 }
  0x46   : > { %858 = vmatpush1.bf16.msra.mxu0 %v1231_v3 }
  0x47   : > { %1157 = vmatpush3.bf16.msra.mxu1 %v1234_v4  ;;  %859 = vmatprep.subr.bf16.mxu0 %v1237_v5 }
  0x48   : > { %1158 = vmatprep.subr.bf16.mxu1 %v1251_v1  ;;  %v1074_v1 = vld [vmem:[%s1552_s4] ss:$0 sm:$0xff] }
  0x4a   : > { %860 = vmatpush1.bf16.msra.mxu0 %v1235_v6 }
  0x4b   : > { %1159 = vmatpush3.bf16.msra.mxu1 %v1238_v7 }
  0xec   : > { %v627_v29 = vpop.f32.mrf.mxu1 }
  0xed   : > { %v634_v30 = vrot.slane %v627_v29, 1  ;;  %v586_v31 = vpop.f32.mrf.mxu0 }
  0xee   : > { %v633_v32 = vrot.slane %v586_v31, 7  ;;  %v1142_v33 = vpop.f32.mrf.mxu1 }
  0xef   : > { %v588_v34 = vpop.f32.mrf.mxu0  ;;  %v640_v35 = vsel %vm388_vm1, 0.0, %v634_v30 }
  0xf0   : > { %v637_v36 = vsel %vm387_vm2, 0.0, %v633_v32  ;;  %v630_v37 = vpop.f32.mrf.mxu1 }
  0xf1   : > { %v641_v38 = vadd.f32 %v637_v36, %v588_v34  ;;  %v590_v39 = vpop.f32.mrf.mxu0  ;;  %v1099_v34 = vld [vmem:[%s1554_s6] ss:$0 sm:$0xff] }
  0xf2   : > { %v1143_v40 = vpop.f32.mrf.mxu1 }
  0xf3   : > { %v642_v42 = vadd.f32 %v641_v38, %v640_v35  ;;  %v591_v43 = vpop.f32.mrf.mxu0 }
  0xf5   : > { %v649_v44 = vadd.f32 %v1072_v41, %v642_v42 }
  0xf7   : > { %v1430_v45 = vmax.f32 %v649_v44, 0.0 }
  0xf9   : > { %651 = vadd.xlane.f32.xlu0 %v1430_v45  ;;  %v654_v46 = vmul.f32 %v1430_v45, %v1430_v45 }
  0xfd   : > { %655 = vadd.xlane.f32.xlu0 %v654_v46 }
 0x182   : > { %v652_v8 = vpop.xlane.xlu0 %651 }
 0x183   : > { %v653_v9 = vmul.f32 0.03125, %v652_v8 }
 0x185   : > { %v658_v11 = vmul.f32 %v653_v9, %v653_v9  ;;  %v660_v15 = vsub.f32 %v1430_v45, %v653_v9 }
 0x186   : > { %v656_v10 = vpop.xlane.xlu0 %655 }
 0x187   : > { %v657_v12 = vmul.f32 0.03125, %v656_v10 }
 0x189   : > { %v659_v13 = vsub.f32 %v657_v12, %v658_v11 }
 0x18b   : > { %v661_v14 = vadd.f32 1e-05, %v659_v13 }
 0x18d   : > { %1239 = vrsqrt.f32 %v661_v14 }
 0x19a   : > { %v1240_v16 = vpop.eup %1239 }
 0x19b   : > { %v663_v18 = vmul.f32 %v1240_v16, %v660_v15 }
 0x19d   : > { %v670_v19 = vmul.f32 %v1073_v17, %v663_v18 }
 0x19f   : > { %v677_v20 = vadd.f32 %v1074_v1, %v670_v19 }
 0x1a1   : > { %v681_v21 = vpack.c.bf16 %v677_v20, %v677_v20 }
 0x1a3   : > { %878 = vmatmul.mubr.bf16.vlgmr.msra.gmra.mxu0 %v681_v21  ;;  %1161 = vmatmul.mubr.bf16.vlgmr.msra.gmra.mxu1 %v681_v21 }
 0x263   : > { %v879_v22 = vpop.f32.mrf.mxu0  ;;  %v920_v23 = vpop.f32.mrf.mxu1 }
 0x264   : > { %v926_v24 = vrot.slane %v879_v22, 7  ;;  %v927_v25 = vrot.slane %v920_v23, 1 }
 0x265   : > { %v881_v26 = vpop.f32.mrf.mxu0  ;;  %v1162_v27 = vpop.f32.mrf.mxu1 }
 0x266   : > { %v928_v29 = vsel %vm387_vm2, 0.0, %v926_v24  ;;  %v929_v33 = vsel %vm388_vm1, 0.0, %v927_v25 }
 0x267   : > { %v930_v30 = vadd.f32 %v928_v29, %v881_v26  ;;  %v883_v31 = vpop.f32.mrf.mxu0  ;;  %v923_v32 = vpop.f32.mrf.mxu1 }
 0x269   : > { %v931_v35 = vadd.f32 %v930_v30, %v929_v33  ;;  %v884_v36 = vpop.f32.mrf.mxu0  ;;  %v1163_v37 = vpop.f32.mrf.mxu1 }
 0x26b   : > { %v938_v38 = vadd.f32 %v1099_v34, %v931_v35 }
 0x26d   : > { %v939_v39 = vmax.f32 %v938_v38, 0.0 }
 0x26f   : > { %940 = vadd.xlane.f32.xlu1 %v939_v39  ;;  %v943_v40 = vmul.f32 %v939_v39, %v939_v39 }
 0x273   : > { %944 = vadd.xlane.f32.xlu1 %v943_v40 }
 0x2f8   : > { %v941_v41 = vpop.xlane.xlu1 %940 }
 0x2f9   : > { %v942_v42 = vmul.f32 0.03125, %v941_v41 }
 0x2fb   : > { %v947_v44 = vmul.f32 %v942_v42, %v942_v42  ;;  %v949_v47 = vsub.f32 %v939_v39, %v942_v42 }
 0x2fc   : > { %v945_v43 = vpop.xlane.xlu1 %944 }
 0x2fd   : > { %v946_v45 = vmul.f32 0.03125, %v945_v43 }
 0x2ff   : > { %v948_v46 = vsub.f32 %v946_v45, %v947_v44 }
 0x301   : > { %v950_v28 = vadd.f32 1e-05, %v948_v46 }
 0x303   : > { %1241 = vrsqrt.f32 %v950_v28 }
 0x310   : > { %v1242_v48 = vpop.eup %1241 }
 0x311   : > { %v952_v50 = vmul.f32 %v1242_v48, %v949_v47 }
 0x313   : > { %v959_v52 = vmul.f32 %v1100_v49, %v952_v50 }
 0x315   : > { %v966_v54 = vadd.f32 %v1101_v51, %v959_v52 }
 0x317   : > { %v975_v55 = vmul.f32 %v1102_v53, %v966_v54 }
 0x319   : > { %976 = vadd.xlane.f32.xlu0 %v975_v55 }
 0x3a2   : > { %v977_v57 = vpop.xlane.xlu0 %976 }
 0x3a3   : > { %v985_v58 = vadd.f32 %v1103_v56, %v977_v57 }
 0x3a5   : > { %v986_v59 = vpack.c.bf16 %v985_v58, %v985_v58 }
 0x3a7   : > { %987 = vst [vmem:[%s381_s22] sm:$0xf] %v986_v59 }
 0x3a8 PF: > { %s21_s17 = sadd.s32 1, %s1249_s17  }
 0x3a9   : > { %p18_p4 = scmp.ge.s32.totalorder %s21_s17, 4  }
 0x3ab   :  { %20 = sbr.rel (!%p18_p4) target bundleno = 1 (0x1), region = 94 }

// kernel: fastspeech_forward.5
= control target key start
LH: loop header
LB: loop body
LE: loop exit
PB: predicated region body
PF: predicated region fallthrough
CT: control target
= control target key end

     0   :  { %s764_s21 = smov 0   ;;  %s845_s0 = inlined_call_operand.vmem [shape: bf16[32,128], index: 0, kind: input, shape index: {}]   ;;  %s846_s1 = inlined_call_operand.vmem [shape: s32[32,1], index: 1, kind: input, shape index: {}]   ;;  %s847_s2 = inlined_call_operand.vmem [shape: bf16[128,128], index: 2, kind: input, shape index: {}]   ;;  %s848_s3 = inlined_call_operand.vmem [shape: f32[1,128], index: 3, kind: input, shape index: {}]   ;;  %s849_s4 = inlined_call_operand.vmem [shape: bf16[128,128], index: 4, kind: input, shape index: {}]   ;;  %s850_s5 = inlined_call_operand.vmem [shape: f32[1,128], index: 5, kind: input, shape index: {}]   ;;  %s851_s6 = inlined_call_operand.vmem [shape: f32[32,128], index: 6, kind: output, shape index: {}]  }
   0x1 LB: > { %s599_s22 = sadd.s32 4294967295, %s724_s21   ;;  %p603_p0 = scmp.ge.s32.totalorder %s724_s21, 1  ;;  %s724_s21 = sphi %s764_s21, %s16_s21  }
   0x2   : > { %p224_p1 = scmp.lt.s32.totalorder %s724_s21, 3 }
   0x4   : > { %p225_p2 = pnand %p603_p0, %p224_p1 }
   0x5   : > { %s604_s27 = sshll.u32 (!%p225_p2), %s599_s22, 1 }
   0x6   : > { %228 = sbr.rel (%p225_p2) target bundleno = 448 (0x1c0), region = 44  ;;  %p260_p3 = scmp.lt.s32.totalorder (!%p225_p2), %s604_s27, 3 }
   0xb   : > { %v701_v0 = vld [vmem:[%s847_s2 + $0x38] sm:$0xff]   ;;  %v726_v1 = vmov 0.0   ;;  %v702_v2 = vld [vmem:[%s847_s2 + $0x30] sm:$0xff]   ;;  %vm727_vm0 = vmmov 0   ;;  %s853_s27 = smov (!%p260_p3, %s604_s27), 3  ;;  %v703_v3 = vld [vmem:[%s847_s2 + $0x28] sm:$0xff]  }
   0xc   : > { %649 = vmatprep.subr.bf16.mxu0 %v726_v1  ;;  %669 = vmatprep.subr.bf16.mxu1 %v726_v1  ;;  %s605_s30 = sshll.u32 %s853_s27, 2  ;;  %v710_v4 = vld [vmem:[%s849_s4 + $0x38] sm:$0xff]   ;;  %v704_v5 = vld [vmem:[%s847_s2 + $0x20] sm:$0xff]   ;;  %v711_v6 = vld [vmem:[%s849_s4 + $0x30] sm:$0xff]   ;;  %v728_v18 = vmov 0  }
   0xd   : > { %650 = vmatpush3.bf16.msra.mxu0 %v701_v0  ;;  %665 = vmatprep.mubr.msk.bf16.mxu0 %vm727_vm0, %v726_v1  ;;  %s787_s9 = scalar_lea.vmem %s845_s0, %s605_s30  ;;  %v705_v7 = vld [vmem:[%s847_s2 + $0x18] sm:$0xff]   ;;  %v712_v8 = vld [vmem:[%s849_s4 + $0x28] sm:$0xff]   ;;  %v706_v9 = vld [vmem:[%s847_s2 + $0x10] sm:$0xff]  }
   0xe   : > { %651 = vmatprep.subr.bf16.mxu0 %v726_v1  ;;  %685 = vmatprep.mubr.msk.bf16.mxu1 %vm727_vm0, %v726_v1  ;;  %v713_v10 = vld [vmem:[%s849_s4 + $0x20] sm:$0xff]   ;;  %v707_v11 = vld [vmem:[%s847_s2 + $0x8] sm:$0xff]   ;;  %v714_v12 = vld [vmem:[%s849_s4 + $0x18] sm:$0xff]  }
   0xf   : > { %670 = vmatpush3.bf16.msra.mxu1 %v710_v4  ;;  %v708_v13 = vld [vmem:[%s847_s2] sm:$0xff]   ;;  %v715_v15 = vld [vmem:[%s849_s4 + $0x10] sm:$0xff]   ;;  %v716_v16 = vld [vmem:[%s849_s4 + $0x8] sm:$0xff]   ;;  %700 = vset.pattern.permute.xlu0 %v728_v18 }
  0x10   : > { %671 = vmatprep.subr.bf16.mxu1 %v726_v1  ;;  %v709_v14 = vld [vmem:[%s787_s9] sm:$0xff]   ;;  %s607_s9 = sshll.u32 %s853_s27, 3 }
  0x11   : > { %652 = vmatpush3.bf16.msra.mxu0 %v702_v2  ;;  %v717_v17 = vld [vmem:[%s849_s4] sm:$0xff]   ;;  %s269_s17 = scalar_lea.vmem %s846_s1, %s607_s9  ;;  %s275_s24 = scalar_lea.vmem %s851_s6, %s607_s9 }
  0x12   : > { %653 = vmatprep.subr.bf16.mxu0 %v726_v1  ;;  %v513_v19 = vld [vmem:[%s269_s17] sm:$0xff]  ;;  %v514_v20 = vld [vmem:[%s269_s17 + $0x8] sm:$0xff] }
  0x13   : > { %672 = vmatpush3.bf16.msra.mxu1 %v711_v6  ;;  %vm515_vm1 = vcmp.eq.s32.totalorder %v513_v19, 0  ;;  %vm516_vm2 = vcmp.eq.s32.totalorder %v514_v20, 0  ;;  %v610_v23 = vld [vmem:[%s848_s3] ss:$0 sm:$0xff] }
  0x14   : > { %673 = vmatprep.subr.bf16.mxu1 %v726_v1  ;;  %v517_v21 = vsel %vm515_vm1, 1, %v728_v18  ;;  %v518_v22 = vsel %vm516_vm2, 1, %v728_v18  ;;  %v620_v34 = vld [vmem:[%s850_s5] ss:$0 sm:$0xff] }
  0x15   : > { %654 = vmatpush3.bf16.msra.mxu0 %v703_v3  ;;  %520 = vperm.xlu0 %700, %v517_v21  }
  0x16   : > { %655 = vmatprep.subr.bf16.mxu0 %v726_v1 }
  0x17   : > { %674 = vmatpush3.bf16.msra.mxu1 %v712_v8 }
  0x18   : > { %675 = vmatprep.subr.bf16.mxu1 %v726_v1 }
  0x19   : > { %656 = vmatpush3.bf16.msra.mxu0 %v704_v5  ;;  %523 = vperm.xlu0 %700, %v518_v22  }
  0x1a   : > { %657 = vmatprep.subr.bf16.mxu0 %v726_v1 }
  0x1b   : > { %676 = vmatpush3.bf16.msra.mxu1 %v713_v10 }
  0x1c   : > { %677 = vmatprep.subr.bf16.mxu1 %v726_v1 }
  0x1d   : > { %658 = vmatpush3.bf16.msra.mxu0 %v705_v7 }
  0x1e   : > { %659 = vmatprep.subr.bf16.mxu0 %v726_v1 }
  0x1f   : > { %678 = vmatpush3.bf16.msra.mxu1 %v714_v12 }
  0x20   : > { %679 = vmatprep.subr.bf16.mxu1 %v726_v1 }
  0x21   : > { %660 = vmatpush3.bf16.msra.mxu0 %v706_v9 }
  0x22   : > { %661 = vmatprep.subr.bf16.mxu0 %v726_v1 }
  0x23   : > { %680 = vmatpush3.bf16.msra.mxu1 %v715_v15 }
  0x24   : > { %681 = vmatprep.subr.bf16.mxu1 %v726_v1 }
  0x25   : > { %662 = vmatpush3.bf16.msra.mxu0 %v707_v11 }
  0x26   : > { %663 = vmatprep.subr.bf16.mxu0 %v726_v1 }
  0x27   : > { %682 = vmatpush3.bf16.msra.mxu1 %v716_v16 }
  0x28   : > { %683 = vmatprep.subr.bf16.mxu1 %v726_v1 }
  0x29   : > { %664 = vmatpush3.bf16.msra.mxu0 %v708_v13 }
  0x2b   : > { %684 = vmatpush3.bf16.msra.mxu1 %v717_v17 }
  0x2c   : > { %666 = vmatmul.mubr.bf16.vlgmr.msra.gmra.mxu0 %v709_v14 }
  0x90   : > { %v521_v33 = vpop.permute.xlu0 %520 }
  0x91   : > { %vm525_vm3 = vcmp.eq.s32.totalorder %v521_v33, 1 }
  0x94   : > { %v524_v39 = vpop.permute.xlu0 %523 }
  0x95   : > { %vm526_vm4 = vcmp.eq.s32.totalorder %v524_v39, 1 }
  0xec   : > { %v391_v24 = vpop.f32.mrf.mxu0 }
  0xed   : > { %v392_v26 = vadd.f32 %v610_v23, %v391_v24 }
  0xee   : > { %v667_v25 = vpop.f32.mrf.mxu0 }
  0xef   : > { %v398_v30 = vmax.f32 %v392_v26, 0.0 }
  0xf0   : > { %v394_v27 = vpop.f32.mrf.mxu0 }
  0xf1   : > { %v395_v28 = vadd.f32 %v610_v23, %v394_v27 }
  0xf2   : > { %v668_v29 = vpop.f32.mrf.mxu0 }
  0xf3   : > { %v399_v31 = vmax.f32 %v395_v28, 0.0 }
  0xf5   : > { %v400_v32 = vpack.c.bf16 %v399_v31, %v398_v30 }
  0xf7   : > { %686 = vmatmul.mubr.bf16.vlgmr.msra.gmra.mxu1 %v400_v32 }
 0x1b7   : > { %v506_v35 = vpop.f32.mrf.mxu1 }
 0x1b8   : > { %v507_v36 = vadd.f32 %v620_v34, %v506_v35 }
 0x1b9   : > { %v687_v37 = vpop.f32.mrf.mxu1 }
 0x1ba   : > { %v527_v38 = vsel %vm525_vm3, %v507_v36, 0.0 }
 0x1bb   : > { %529 = vst [vmem:[%s275_s24] sm:$0xff] %v527_v38  ;;  %v509_v40 = vpop.f32.mrf.mxu1 }
 0x1bc   : > { %v510_v41 = vadd.f32 %v620_v34, %v509_v40 }
 0x1bd   : > { %v688_v42 = vpop.f32.mrf.mxu1 }
 0x1be   : > { %v528_v43 = vsel %vm526_vm4, %v510_v41, 0.0 }
 0x1bf   : > { %530 = vst [vmem:[%s275_s24 + $0x8] sm:$0xff] %v528_v43 }
 0x1c0 PF: > { %s16_s21 = sadd.s32 1, %s724_s21  }
 0x1c1   : > { %p13_p4 = scmp.ge.s32.totalorder %s16_s21, 4  }
 0x1c3   :  { %15 = sbr.rel (!%p13_p4) target bundleno = 1 (0x1), region = 77 }

</bundles_post_ra>
